<compile_context>
chip_gen: v7x
topology: tpu7x:2x2x1
jax: 0.10.0
libtpu: 0.0.40
codegen_flags: <defaults>
</compile_context>

<pallas_src>
import functools
import numpy as np
import jax
import jax.numpy as jnp
from jax.experimental import pallas as pl
from jax.experimental.pallas import tpu as pltpu


# ----------------------------------------------------------------------------
# shared helpers
# ----------------------------------------------------------------------------
def _layer_norm(v, g, b, eps=1e-5):
    mu = jnp.mean(v, axis=-1, keepdims=True)
    var = jnp.mean((v - mu) ** 2, axis=-1, keepdims=True)
    return (v - mu) * jax.lax.rsqrt(var + eps) * g + b


_W_ORDER = ("wq", "bq", "wk", "bk", "wv", "bv", "wo", "bo",
            "ln1g", "ln1b", "cw1", "cb1", "cw2", "cb2", "ln2g", "ln2b")

_PACKED_ORDER = _W_ORDER


# ----------------------------------------------------------------------------
# pure-JAX reference for one FFT block (used by the use_pallas=False check)
# ----------------------------------------------------------------------------
def _fft_block_math(x, keep, negb, w, n_head, ksize, mxu_dtype=jnp.float32):
    """x: (L, D) f32; keep: (L, 1) 1.0=valid; negb: (1, L) -1e9 at padded keys."""
    (wq, bq, wk, bk, wv, bv, wo, bo,
     ln1g, ln1b, cw1, cb1, cw2, cb2, ln2g, ln2b) = w
    L, D = x.shape
    dk = D // n_head
    inv_temp = 1.0 / np.sqrt(dk)
    md = mxu_dtype
    f32 = jnp.float32

    xm = x.astype(md)
    q = jnp.dot(xm, wq.astype(md), preferred_element_type=f32) + bq
    k = jnp.dot(xm, wk.astype(md), preferred_element_type=f32) + bk
    v = jnp.dot(xm, wv.astype(md), preferred_element_type=f32) + bv

    heads = []
    for h in range(n_head):
        qh = q[:, h * dk:(h + 1) * dk].astype(md)
        kh = k[:, h * dk:(h + 1) * dk].astype(md)
        vh = v[:, h * dk:(h + 1) * dk].astype(md)
        s = jnp.dot(qh, kh.T, preferred_element_type=f32) * inv_temp + negb
        m = jnp.max(s, axis=-1, keepdims=True)
        e = jnp.exp(s - m)
        p = e / jnp.sum(e, axis=-1, keepdims=True)
        heads.append(jnp.dot(p.astype(md), vh, preferred_element_type=f32))
    attn_out = jnp.concatenate(heads, axis=-1)                       # (L, D)
    attn_out = jnp.dot(attn_out.astype(md), wo.astype(md),
                       preferred_element_type=f32) + bo

    y = _layer_norm(attn_out + x, ln1g, ln1b)
    y = y * keep                                                     # masked_fill(pad, 0)

    # position-wise feed-forward: two Conv1d over L with 'same' padding, ReLU between
    pad = (ksize - 1) // 2
    dconv = cw1.shape[-1]
    ypad = jnp.concatenate(
        [jnp.zeros((pad, D), f32), y, jnp.zeros((pad, D), f32)], axis=0)
    h1 = jnp.broadcast_to(cb1, (L, dconv))
    for j in range(ksize):
        h1 = h1 + jnp.dot(ypad[j:j + L, :].astype(md), cw1[j].astype(md),
                          preferred_element_type=f32)
    h1 = jnp.maximum(h1, 0.0)
    hpad = jnp.concatenate(
        [jnp.zeros((pad, dconv), f32), h1, jnp.zeros((pad, dconv), f32)], axis=0)
    h2 = jnp.broadcast_to(cb2, (L, D))
    for j in range(ksize):
        h2 = h2 + jnp.dot(hpad[j:j + L, :].astype(md), cw2[j].astype(md),
                          preferred_element_type=f32)

    out = _layer_norm(h2 + y, ln2g, ln2b)
    return out * keep


# ----------------------------------------------------------------------------
# Pallas kernel: one FFT-block layer per grid step, activation carried in VMEM
#   grid = (num_batch_blocks, n_layers); layer axis ("arbitrary") is innermost
# ----------------------------------------------------------------------------
def encoder_stack_kernel(lens_ref, x_ref,
                         wq_ref, bq_ref, wk_ref, bk_ref, wv_ref, bv_ref,
                         wo_ref, bo_ref, ln1g_ref, ln1b_ref,
                         cw1_ref, cb1_ref, cw2_ref, cb2_ref,
                         ln2g_ref, ln2b_ref,
                         out_ref,
                         xs_ref, ypad_ref, hpad_ref,
                         *, n_head, ksize, mxu_dtype):
    b0 = pl.program_id(0)            # batch-block index
    li = pl.program_id(1)            # layer index (streamed weights)
    f32 = jnp.float32

    Bt, L, D = x_ref.shape
    N = Bt * L
    dk = D // n_head
    inv_temp = 1.0 / np.sqrt(dk)
    pad = (ksize - 1) // 2
    dconv = hpad_ref.shape[-1]
    md = mxu_dtype

    # ---- first layer: load embedded+pos-encoded input into the VMEM carry ----
    @pl.when(li == 0)
    def _():
        xs_ref[...] = x_ref[...].reshape(N, D)

    # ---- padding masks built in-kernel from SMEM-prefetched sequence lengths ----
    keep_rows, neg_rows = [], []
    for i in range(Bt):
        n_i = lens_ref[b0 * Bt + i]
        keep_rows.append(
            (jax.lax.broadcasted_iota(jnp.int32, (L, 1), 0) < n_i).astype(f32))
        neg_rows.append(jnp.where(
            jax.lax.broadcasted_iota(jnp.int32, (1, 1, L), 2) < n_i,
            0.0, -1e9).astype(f32))
    keep_flat = jnp.concatenate(keep_rows, axis=0)     # (N, 1): 1.0 = valid row
    negb = jnp.concatenate(neg_rows, axis=0)           # (Bt, 1, L): additive key mask

    x = xs_ref[...]                                    # (N, D) f32, VMEM-resident carry

    # ---- multi-head self-attention: full-D GEMMs, per-head score/context only ----
    xm = x.astype(md)
    q = jnp.dot(xm, wq_ref[0], preferred_element_type=f32) + bq_ref[0]   # (N, D) f32
    k = jnp.dot(xm, wk_ref[0], preferred_element_type=f32) + bk_ref[0]
    v = jnp.dot(xm, wv_ref[0], preferred_element_type=f32) + bv_ref[0]
    q3 = q.reshape(Bt, L, D)
    k3 = k.reshape(Bt, L, D)
    v3 = v.reshape(Bt, L, D)

    ctx_heads = []
    for h in range(n_head):
        sl = slice(h * dk, (h + 1) * dk)
        s = jnp.einsum('bqd,bkd->bqk',
                       q3[..., sl].astype(md), k3[..., sl].astype(md),
                       preferred_element_type=f32) * inv_temp + negb     # (Bt, L, L) f32
        m = jnp.max(s, axis=-1, keepdims=True)
        e = jnp.exp(s - m)
        p = e / jnp.sum(e, axis=-1, keepdims=True)     # exact division (f32 softmax)
        ctx_heads.append(jnp.einsum('bqk,bkd->bqd',
                                    p.astype(md), v3[..., sl].astype(md),
                                    preferred_element_type=f32))
    ctx = jnp.concatenate(ctx_heads, axis=-1).reshape(N, D)              # head merge
    attn = jnp.dot(ctx.astype(md), wo_ref[0], preferred_element_type=f32) + bo_ref[0]

    y = _layer_norm(attn + x, ln1g_ref[0], ln1b_ref[0]) * keep_flat      # (N, D) f32

    # ---- position-wise conv FFN: per-tap full-K matmuls over pre-padded scratch ----
    if pad > 0:
        zD = jnp.zeros((Bt, pad, D), f32)
        ypad_ref[:, :pad, :] = zD
        ypad_ref[:, pad + L:, :] = zD
    ypad_ref[:, pad:pad + L, :] = y.reshape(Bt, L, D)
    h1 = jnp.zeros((N, dconv), f32)
    for j in range(ksize):
        tap = ypad_ref[:, j:j + L, :].reshape(N, D)
        h1 = h1 + jnp.dot(tap.astype(md), cw1_ref[0, j], preferred_element_type=f32)
    h1 = jnp.maximum(h1 + cb1_ref[0], 0.0)                               # (N, dconv)

    if pad > 0:
        zC = jnp.zeros((Bt, pad, dconv), f32)
        hpad_ref[:, :pad, :] = zC
        hpad_ref[:, pad + L:, :] = zC
    hpad_ref[:, pad:pad + L, :] = h1.reshape(Bt, L, dconv)
    h2 = jnp.zeros((N, D), f32)
    for j in range(ksize):
        tap = hpad_ref[:, j:j + L, :].reshape(N, dconv)
        h2 = h2 + jnp.dot(tap.astype(md), cw2_ref[0, j], preferred_element_type=f32)
    h2 = h2 + cb2_ref[0]                                                 # (N, D)

    x_new = _layer_norm(h2 + y, ln2g_ref[0], ln2b_ref[0]) * keep_flat
    xs_ref[...] = x_new                                                  # carry to next layer

    @pl.when(li == pl.num_programs(1) - 1)
    def _():
        # TODO(synk): at real d_model>=128 this store is lane-dense; at D=32 it is
        # a masked store, accepted here (single store per batch block).
        out_ref[...] = x_new.reshape(Bt, L, D)


def pack_layer_params(layers, mxu_dtype):
    """Stack per-layer params on a leading layer axis; matmul weights in mxu_dtype."""
    def stack(name, dtype=jnp.float32):
        return jnp.stack([p[name] for p in layers]).astype(dtype)

    return {
        "wq": stack("wq", mxu_dtype), "wk": stack("wk", mxu_dtype),
        "wv": stack("wv", mxu_dtype), "wo": stack("wo", mxu_dtype),
        "bq": stack("bq"), "bk": stack("bk"), "bv": stack("bv"), "bo": stack("bo"),
        "ln1g": stack("ln1g"), "ln1b": stack("ln1b"),
        "cw1": stack("cw1", mxu_dtype), "cb1": stack("cb1"),
        "cw2": stack("cw2", mxu_dtype), "cb2": stack("cb2"),
        "ln2g": stack("ln2g"), "ln2b": stack("ln2b"),
    }


def encoder_stack(x, lengths, packed, *, n_head, ksize,
                  mxu_dtype=jnp.bfloat16, batch_tile=None):
    B, L, D = x.shape
    n_layers = packed["wq"].shape[0]
    dconv = packed["cb1"].shape[-1]
    pad = (ksize - 1) // 2
    Bt = B if batch_tile is None else batch_tile
    assert B % Bt == 0, "batch tile must divide batch"

    w_list = [packed[name] for name in _PACKED_ORDER]

    def wspec(arr):
        nd = arr.ndim
        # one layer's slice per grid step -> weights streamed / double-buffered
        return pl.BlockSpec((1,) + arr.shape[1:],
                            lambda b, l, lens, _nd=nd: (l,) + (0,) * (_nd - 1))

    in_specs = ([pl.BlockSpec((Bt, L, D), lambda b, l, lens: (b, 0, 0))]
                + [wspec(w) for w in w_list])

    kernel = functools.partial(encoder_stack_kernel, n_head=n_head, ksize=ksize,
                               mxu_dtype=mxu_dtype)
    return pl.pallas_call(
        kernel,
        out_shape=jax.ShapeDtypeStruct((B, L, D), jnp.float32),
        grid_spec=pltpu.PrefetchScalarGridSpec(
            num_scalar_prefetch=1,
            grid=(B // Bt, n_layers),                  # layer (carried) axis last
            in_specs=in_specs,
            out_specs=pl.BlockSpec((Bt, L, D), lambda b, l, lens: (b, 0, 0)),
            scratch_shapes=[
                pltpu.VMEM((Bt * L, D), jnp.float32),             # activation carry
                pltpu.VMEM((Bt, L + 2 * pad, D), jnp.float32),    # padded y for conv1
                pltpu.VMEM((Bt, L + 2 * pad, dconv), jnp.float32),  # padded h1 for conv2
            ]),
        compiler_params=pltpu.CompilerParams(
            dimension_semantics=("parallel", "arbitrary"),
            vmem_limit_bytes=32 * 1024 * 1024),
    )(lengths, x, *w_list)


# ----------------------------------------------------------------------------
# glue: embedding, positional encoding, parameter init
# ----------------------------------------------------------------------------
def get_sinusoid_encoding_table(n_position, d_hid):
    pos = np.arange(n_position)[:, None].astype(np.float64)
    hid = np.arange(d_hid)[None, :]
    angle = pos / np.power(10000.0, 2 * (hid // 2) / d_hid)
    table = np.zeros((n_position, d_hid), dtype=np.float64)
    table[:, 0::2] = np.sin(angle[:, 0::2])
    table[:, 1::2] = np.cos(angle[:, 1::2])
    return jnp.asarray(table, dtype=jnp.float32)


def init_encoder_params(key, n_vocab, n_position, n_layers, d_model, d_conv, ksize):
    kemb, klayers = jax.random.split(key)
    emb = 0.1 * jax.random.normal(kemb, (n_vocab, d_model), jnp.float32)
    emb = emb.at[0].set(0.0)                       # padding_idx=0
    layers = []
    for li in range(n_layers):
        ks = jax.random.split(jax.random.fold_in(klayers, li), 8)

        def lin(k, fan_in, shape):
            return jax.random.normal(k, shape, jnp.float32) / np.sqrt(fan_in)

        layers.append(dict(
            wq=lin(ks[0], d_model, (d_model, d_model)), bq=jnp.zeros((1, d_model), jnp.float32),
            wk=lin(ks[1], d_model, (d_model, d_model)), bk=jnp.zeros((1, d_model), jnp.float32),
            wv=lin(ks[2], d_model, (d_model, d_model)), bv=jnp.zeros((1, d_model), jnp.float32),
            wo=lin(ks[3], d_model, (d_model, d_model)), bo=jnp.zeros((1, d_model), jnp.float32),
            ln1g=jnp.ones((1, d_model), jnp.float32), ln1b=jnp.zeros((1, d_model), jnp.float32),
            # conv weights stored as (k, in, out): cw1[j][c, o] == torch_w1[o, c, j]
            cw1=lin(ks[4], d_model * ksize, (ksize, d_model, d_conv)),
            cb1=0.01 * jax.random.normal(ks[5], (1, d_conv), jnp.float32),
            cw2=lin(ks[6], d_conv * ksize, (ksize, d_conv, d_model)),
            cb2=0.01 * jax.random.normal(ks[7], (1, d_model), jnp.float32),
            ln2g=jnp.ones((1, d_model), jnp.float32), ln2b=jnp.zeros((1, d_model), jnp.float32),
        ))
    return dict(emb=emb,
                pos_enc=get_sinusoid_encoding_table(n_position, d_model),
                layers=layers)


def encoder_forward(params, src_seq, mask, *, n_head, ksize,
                    use_pallas=True, mxu_dtype=jnp.bfloat16):
    """src_seq: (B, L) int32; mask: (B, L) bool, True = padding."""
    B, L = src_seq.shape
    x = params["emb"][src_seq] + params["pos_enc"][None, :L, :]      # (B, L, D)

    if use_pallas:
        lengths = jnp.sum(jnp.logical_not(mask), axis=1).astype(jnp.int32)
        packed = pack_layer_params(params["layers"], mxu_dtype)
        return encoder_stack(x, lengths, packed, n_head=n_head, ksize=ksize,
                             mxu_dtype=mxu_dtype)

    keep = (~mask).astype(jnp.float32)[..., None]                    # (B, L, 1)
    negb = jnp.where(mask, -1e9, 0.0).astype(jnp.float32)[:, None, :]  # (B, 1, L)
    for p in params["layers"]:
        w = [p[name] for name in _W_ORDER]
        x = jax.vmap(lambda xi, ki, ni: _fft_block_math(
            xi, ki, ni, w, n_head, ksize, mxu_dtype))(x, keep, negb)
    return x


# ----------------------------------------------------------------------------
if __name__ == "__main__":
    # config (small, consistent with the module)
    B, max_seq_len = 2, 16
    d_model, n_head, n_layers = 32, 2, 2
    d_conv, ksize = 64, 3
    n_vocab = 12                      # len(symbols) + 1
    n_position = max_seq_len + 1
    assert ksize % 2 == 1, "same-padding conv requires odd kernel size"

    key = jax.random.PRNGKey(0)
    kp, ks = jax.random.split(key)
    params = init_encoder_params(kp, n_vocab, n_position, n_layers,
                                 d_model, d_conv, ksize)

    # deterministic inputs: tokens in [1, n_vocab), second sequence padded
    src_seq = jax.random.randint(ks, (B, max_seq_len), 1, n_vocab, dtype=jnp.int32)
    src_seq = src_seq.at[1, 12:].set(0)           # padding tokens (suffix)
    mask = (src_seq == 0)                          # True = pad

    # 1) exact-arithmetic check: f32 MXU operands vs pure-JAX f32 reference
    out_f32 = encoder_forward(params, src_seq, mask, n_head=n_head, ksize=ksize,
                              use_pallas=True, mxu_dtype=jnp.float32)
    ref_f32 = encoder_forward(params, src_seq, mask, n_head=n_head, ksize=ksize,
                              use_pallas=False, mxu_dtype=jnp.float32)
    out_f32, ref_f32 = jax.block_until_ready((out_f32, ref_f32))
    if not np.allclose(np.asarray(out_f32), np.asarray(ref_f32), atol=2e-2, rtol=2e-2):
        raise AssertionError(
            "Pallas(f32)/ref mismatch, max abs diff = "
            f"{np.max(np.abs(np.asarray(out_f32) - np.asarray(ref_f32)))}")

    # 2) production path: bf16 MXU operands (f32 softmax/LN) vs bf16-operand reference
    out_bf = encoder_forward(params, src_seq, mask, n_head=n_head, ksize=ksize,
                             use_pallas=True, mxu_dtype=jnp.bfloat16)
    ref_bf = encoder_forward(params, src_seq, mask, n_head=n_head, ksize=ksize,
                             use_pallas=False, mxu_dtype=jnp.bfloat16)
    out_bf, ref_bf = jax.block_until_ready((out_bf, ref_bf))
    if not np.allclose(np.asarray(out_bf), np.asarray(ref_bf), atol=2e-2, rtol=2e-2):
        raise AssertionError(
            "Pallas(bf16)/ref mismatch, max abs diff = "
            f"{np.max(np.abs(np.asarray(out_bf) - np.asarray(ref_bf)))}")

    assert out_bf.shape == (B, max_seq_len, d_model)
    print("KERNEL_OK")
</pallas_src>

<mosaic_0001>
module attributes {stable_mosaic.version = 11 : i64} {
  func.func @encoder_stack_kernel(%arg0: i32, %arg1: i32, %arg2: memref<2xi32, #tpu.memory_space<smem>>, %arg3: memref<2x16x32xf32, #tpu.memory_space<vmem>>, %arg4: memref<1x32x32xf32, #tpu.memory_space<vmem>>, %arg5: memref<1x1x32xf32, #tpu.memory_space<vmem>>, %arg6: memref<1x32x32xf32, #tpu.memory_space<vmem>>, %arg7: memref<1x1x32xf32, #tpu.memory_space<vmem>>, %arg8: memref<1x32x32xf32, #tpu.memory_space<vmem>>, %arg9: memref<1x1x32xf32, #tpu.memory_space<vmem>>, %arg10: memref<1x32x32xf32, #tpu.memory_space<vmem>>, %arg11: memref<1x1x32xf32, #tpu.memory_space<vmem>>, %arg12: memref<1x1x32xf32, #tpu.memory_space<vmem>>, %arg13: memref<1x1x32xf32, #tpu.memory_space<vmem>>, %arg14: memref<1x3x32x64xf32, #tpu.memory_space<vmem>>, %arg15: memref<1x1x64xf32, #tpu.memory_space<vmem>>, %arg16: memref<1x3x64x32xf32, #tpu.memory_space<vmem>>, %arg17: memref<1x1x32xf32, #tpu.memory_space<vmem>>, %arg18: memref<1x1x32xf32, #tpu.memory_space<vmem>>, %arg19: memref<1x1x32xf32, #tpu.memory_space<vmem>>, %arg20: memref<2x16x32xf32, #tpu.memory_space<vmem>>, %arg21: memref<32x32xf32, #tpu.memory_space<vmem>>, %arg22: memref<2x18x32xf32, #tpu.memory_space<vmem>>, %arg23: memref<2x18x64xf32, #tpu.memory_space<vmem>>) attributes {dimension_semantics = [#tpu.dimension_semantics<parallel>, #tpu.dimension_semantics<arbitrary>], iteration_bounds = array<i64: 1, 2>, scalar_prefetch = 1 : i64, scratch_operands = 3 : i64, tpu.core_type = #tpu.core_type<tc>, window_params = [{transform_indices = @transform_0, window_bounds = array<i64: 2, 16, 32>}, {transform_indices = @transform_1, window_bounds = array<i64: 1, 32, 32>}, {transform_indices = @transform_2, window_bounds = array<i64: 1, 1, 32>}, {transform_indices = @transform_3, window_bounds = array<i64: 1, 32, 32>}, {transform_indices = @transform_4, window_bounds = array<i64: 1, 1, 32>}, {transform_indices = @transform_5, window_bounds = array<i64: 1, 32, 32>}, {transform_indices = @transform_6, window_bounds = array<i64: 1, 1, 32>}, {transform_indices = @transform_7, window_bounds = array<i64: 1, 32, 32>}, {transform_indices = @transform_8, window_bounds = array<i64: 1, 1, 32>}, {transform_indices = @transform_9, window_bounds = array<i64: 1, 1, 32>}, {transform_indices = @transform_10, window_bounds = array<i64: 1, 1, 32>}, {transform_indices = @transform_11, window_bounds = array<i64: 1, 3, 32, 64>}, {transform_indices = @transform_12, window_bounds = array<i64: 1, 1, 64>}, {transform_indices = @transform_13, window_bounds = array<i64: 1, 3, 64, 32>}, {transform_indices = @transform_14, window_bounds = array<i64: 1, 1, 32>}, {transform_indices = @transform_15, window_bounds = array<i64: 1, 1, 32>}, {transform_indices = @transform_16, window_bounds = array<i64: 1, 1, 32>}, {transform_indices = @transform_17, window_bounds = array<i64: 2, 16, 32>}]} {
    %c0_i32 = arith.constant 0 : i32
    %0 = arith.cmpi eq, %arg1, %c0_i32 : i32
    %1 = arith.extui %0 : i1 to i32
    %c0_i32_0 = arith.constant 0 : i32
    %2 = arith.cmpi ne, %1, %c0_i32_0 : i32
    scf.if %2 {
      %c0_145 = arith.constant 0 : index
      %c0_146 = arith.constant 0 : index
      %c0_147 = arith.constant 0 : index
      %225 = vector.load %arg3[%c0_145, %c0_146, %c0_147] : memref<2x16x32xf32, #tpu.memory_space<vmem>>, vector<2x16x32xf32>
      %226 = vector.shape_cast %225 : vector<2x16x32xf32> to vector<32x32xf32>
      %c0_148 = arith.constant 0 : index
      %c0_149 = arith.constant 0 : index
      %227 = vector.load %arg21[%c0_148, %c0_149] : memref<32x32xf32, #tpu.memory_space<vmem>>, vector<32x32xf32>
      tpu.vector_store %arg21[%c0_148, %c0_149], %226 {strides = array<i32>} : memref<32x32xf32, #tpu.memory_space<vmem>>, vector<32x32xf32>,
    } else {
    }
    %c2_i32 = arith.constant 2 : i32
    %3 = arith.muli %arg0, %c2_i32 : i32
    %c0_i32_1 = arith.constant 0 : i32
    %4 = arith.addi %3, %c0_i32_1 : i32
    %5 = arith.index_cast %4 : i32 to index
    %6 = memref.load %arg2[%5] : memref<2xi32, #tpu.memory_space<smem>>
    %7 = tpu.iota {dimensions = array<i32: 0>} : vector<16x1xi32>
    %8 = vector.broadcast %6 : i32 to vector<16x1xi32>
    %9 = arith.cmpi slt, %7, %8 : vector<16x1xi32>
    %10 = arith.extui %9 : vector<16x1xi1> to vector<16x1xi32>
    %11 = arith.sitofp %10 : vector<16x1xi32> to vector<16x1xf32>
    %12 = tpu.iota {dimensions = array<i32: 2>} : vector<1x1x16xi32>
    %13 = vector.broadcast %6 : i32 to vector<1x1x16xi32>
    %14 = arith.cmpi slt, %12, %13 : vector<1x1x16xi32>
    %cst = arith.constant 0.000000e+00 : f32
    %cst_2 = arith.constant -1.000000e+09 : f32
    %15 = vector.broadcast %cst : f32 to vector<1x1x16xf32>
    %16 = vector.broadcast %cst_2 : f32 to vector<1x1x16xf32>
    %17 = arith.select %14, %15, %16 : vector<1x1x16xi1>, vector<1x1x16xf32>
    %c2_i32_3 = arith.constant 2 : i32
    %18 = arith.muli %arg0, %c2_i32_3 : i32
    %c1_i32 = arith.constant 1 : i32
    %19 = arith.addi %18, %c1_i32 : i32
    %20 = arith.index_cast %19 : i32 to index
    %21 = memref.load %arg2[%20] : memref<2xi32, #tpu.memory_space<smem>>
    %22 = tpu.iota {dimensions = array<i32: 0>} : vector<16x1xi32>
    %23 = vector.broadcast %21 : i32 to vector<16x1xi32>
    %24 = arith.cmpi slt, %22, %23 : vector<16x1xi32>
    %25 = arith.extui %24 : vector<16x1xi1> to vector<16x1xi32>
    %26 = arith.sitofp %25 : vector<16x1xi32> to vector<16x1xf32>
    %27 = tpu.iota {dimensions = array<i32: 2>} : vector<1x1x16xi32>
    %28 = vector.broadcast %21 : i32 to vector<1x1x16xi32>
    %29 = arith.cmpi slt, %27, %28 : vector<1x1x16xi32>
    %cst_4 = arith.constant 0.000000e+00 : f32
    %cst_5 = arith.constant -1.000000e+09 : f32
    %30 = vector.broadcast %cst_4 : f32 to vector<1x1x16xf32>
    %31 = vector.broadcast %cst_5 : f32 to vector<1x1x16xf32>
    %32 = arith.select %29, %30, %31 : vector<1x1x16xi1>, vector<1x1x16xf32>
    %33 = tpu.concatenate %11, %26 in 0 : vector<16x1xf32>, vector<16x1xf32> -> vector<32x1xf32>
    %34 = tpu.concatenate %17, %32 in 0 : vector<1x1x16xf32>, vector<1x1x16xf32> -> vector<2x1x16xf32>
    %c0 = arith.constant 0 : index
    %c0_6 = arith.constant 0 : index
    %35 = vector.load %arg21[%c0, %c0_6] : memref<32x32xf32, #tpu.memory_space<vmem>>, vector<32x32xf32>
    %c0_7 = arith.constant 0 : index
    %c0_8 = arith.constant 0 : index
    %c0_9 = arith.constant 0 : index
    %36 = vector.load %arg4[%c0_7, %c0_8, %c0_9] : memref<1x32x32xf32, #tpu.memory_space<vmem>>, vector<1x32x32xf32>
    %37 = vector.shape_cast %36 : vector<1x32x32xf32> to vector<32x32xf32>
    %cst_10 = arith.constant dense<0.000000e+00> : vector<32x32xf32>
    %38 = tpu.matmul %35, %37, %cst_10 {dimension_numbers = #tpu.dot_dimension_numbers<[1], [0], [0], [1], [0, 0, 1, 1], [], []>} : vector<32x32xf32>, vector<32x32xf32>, vector<32x32xf32> -> vector<32x32xf32>
    %c0_11 = arith.constant 0 : index
    %c0_12 = arith.constant 0 : index
    %c0_13 = arith.constant 0 : index
    %39 = vector.load %arg5[%c0_11, %c0_12, %c0_13] : memref<1x1x32xf32, #tpu.memory_space<vmem>>, vector<1x1x32xf32>
    %40 = vector.shape_cast %39 : vector<1x1x32xf32> to vector<1x32xf32>
    %41 = vector.broadcast %40 : vector<1x32xf32> to vector<32x32xf32>
    %42 = arith.addf %38, %41 : vector<32x32xf32>
    %c0_14 = arith.constant 0 : index
    %c0_15 = arith.constant 0 : index
    %c0_16 = arith.constant 0 : index
    %43 = vector.load %arg6[%c0_14, %c0_15, %c0_16] : memref<1x32x32xf32, #tpu.memory_space<vmem>>, vector<1x32x32xf32>
    %44 = vector.shape_cast %43 : vector<1x32x32xf32> to vector<32x32xf32>
    %cst_17 = arith.constant dense<0.000000e+00> : vector<32x32xf32>
    %45 = tpu.matmul %35, %44, %cst_17 {dimension_numbers = #tpu.dot_dimension_numbers<[1], [0], [0], [1], [0, 0, 1, 1], [], []>} : vector<32x32xf32>, vector<32x32xf32>, vector<32x32xf32> -> vector<32x32xf32>
    %c0_18 = arith.constant 0 : index
    %c0_19 = arith.constant 0 : index
    %c0_20 = arith.constant 0 : index
    %46 = vector.load %arg7[%c0_18, %c0_19, %c0_20] : memref<1x1x32xf32, #tpu.memory_space<vmem>>, vector<1x1x32xf32>
    %47 = vector.shape_cast %46 : vector<1x1x32xf32> to vector<1x32xf32>
    %48 = vector.broadcast %47 : vector<1x32xf32> to vector<32x32xf32>
    %49 = arith.addf %45, %48 : vector<32x32xf32>
    %c0_21 = arith.constant 0 : index
    %c0_22 = arith.constant 0 : index
    %c0_23 = arith.constant 0 : index
    %50 = vector.load %arg8[%c0_21, %c0_22, %c0_23] : memref<1x32x32xf32, #tpu.memory_space<vmem>>, vector<1x32x32xf32>
    %51 = vector.shape_cast %50 : vector<1x32x32xf32> to vector<32x32xf32>
    %cst_24 = arith.constant dense<0.000000e+00> : vector<32x32xf32>
    %52 = tpu.matmul %35, %51, %cst_24 {dimension_numbers = #tpu.dot_dimension_numbers<[1], [0], [0], [1], [0, 0, 1, 1], [], []>} : vector<32x32xf32>, vector<32x32xf32>, vector<32x32xf32> -> vector<32x32xf32>
    %c0_25 = arith.constant 0 : index
    %c0_26 = arith.constant 0 : index
    %c0_27 = arith.constant 0 : index
    %53 = vector.load %arg9[%c0_25, %c0_26, %c0_27] : memref<1x1x32xf32, #tpu.memory_space<vmem>>, vector<1x1x32xf32>
    %54 = vector.shape_cast %53 : vector<1x1x32xf32> to vector<1x32xf32>
    %55 = vector.broadcast %54 : vector<1x32xf32> to vector<32x32xf32>
    %56 = arith.addf %52, %55 : vector<32x32xf32>
    %57 = vector.shape_cast %42 : vector<32x32xf32> to vector<2x16x32xf32>
    %58 = vector.shape_cast %49 : vector<32x32xf32> to vector<2x16x32xf32>
    %59 = vector.shape_cast %56 : vector<32x32xf32> to vector<2x16x32xf32>
    %60 = vector.extract_strided_slice %57 {offsets = [0, 0, 0], sizes = [2, 16, 16], strides = [1, 1, 1]} : vector<2x16x32xf32> to vector<2x16x16xf32>
    %61 = vector.extract_strided_slice %58 {offsets = [0, 0, 0], sizes = [2, 16, 16], strides = [1, 1, 1]} : vector<2x16x32xf32> to vector<2x16x16xf32>
    "tpu.trace_start"() <{level = 10 : i32, message = "bqd,bkd->bqk"}> : () -> ()
    %cst_28 = arith.constant dense<0.000000e+00> : vector<2x16x16xf32>
    %62 = tpu.matmul %60, %61, %cst_28 {dimension_numbers = #tpu.dot_dimension_numbers<[2], [2], [1], [1], [0, 0, 0, 1, 1, 1], [0], [0]>} : vector<2x16x16xf32>, vector<2x16x16xf32>, vector<2x16x16xf32> -> vector<2x16x16xf32>
    "tpu.trace_stop"() : () -> ()
    %cst_29 = arith.constant 2.500000e-01 : f32
    %63 = vector.broadcast %cst_29 : f32 to vector<2x16x16xf32>
    %64 = arith.mulf %62, %63 : vector<2x16x16xf32>
    %65 = vector.broadcast %34 : vector<2x1x16xf32> to vector<2x16x16xf32>
    %66 = arith.addf %64, %65 : vector<2x16x16xf32>
    %cst_30 = arith.constant dense<0xFF800000> : vector<2x16xf32>
    %67 = vector.multi_reduction <maximumf>, %66, %cst_30 [2] : vector<2x16x16xf32> to vector<2x16xf32>
    %68 = vector.shape_cast %67 : vector<2x16xf32> to vector<2x16x1xf32>
    %69 = vector.broadcast %68 : vector<2x16x1xf32> to vector<2x16x16xf32>
    %70 = arith.subf %66, %69 : vector<2x16x16xf32>
    %71 = math.exp %70 : vector<2x16x16xf32>
    %cst_31 = arith.constant dense<0.000000e+00> : vector<2x16xf32>
    %72 = vector.multi_reduction <add>, %71, %cst_31 [2] : vector<2x16x16xf32> to vector<2x16xf32>
    %73 = vector.shape_cast %72 : vector<2x16xf32> to vector<2x16x1xf32>
    %74 = vector.broadcast %73 : vector<2x16x1xf32> to vector<2x16x16xf32>
    %75 = arith.divf %71, %74 : vector<2x16x16xf32>
    %76 = vector.extract_strided_slice %59 {offsets = [0, 0, 0], sizes = [2, 16, 16], strides = [1, 1, 1]} : vector<2x16x32xf32> to vector<2x16x16xf32>
    "tpu.trace_start"() <{level = 10 : i32, message = "bqk,bkd->bqd"}> : () -> ()
    %cst_32 = arith.constant dense<0.000000e+00> : vector<2x16x16xf32>
    %77 = tpu.matmul %75, %76, %cst_32 {dimension_numbers = #tpu.dot_dimension_numbers<[2], [1], [1], [2], [0, 0, 0, 1, 1, 2], [0], [0]>} : vector<2x16x16xf32>, vector<2x16x16xf32>, vector<2x16x16xf32> -> vector<2x16x16xf32>
    "tpu.trace_stop"() : () -> ()
    %78 = vector.extract_strided_slice %57 {offsets = [0, 0, 16], sizes = [2, 16, 16], strides = [1, 1, 1]} : vector<2x16x32xf32> to vector<2x16x16xf32>
    %79 = vector.extract_strided_slice %58 {offsets = [0, 0, 16], sizes = [2, 16, 16], strides = [1, 1, 1]} : vector<2x16x32xf32> to vector<2x16x16xf32>
    "tpu.trace_start"() <{level = 10 : i32, message = "bqd,bkd->bqk"}> : () -> ()
    %cst_33 = arith.constant dense<0.000000e+00> : vector<2x16x16xf32>
    %80 = tpu.matmul %78, %79, %cst_33 {dimension_numbers = #tpu.dot_dimension_numbers<[2], [2], [1], [1], [0, 0, 0, 1, 1, 1], [0], [0]>} : vector<2x16x16xf32>, vector<2x16x16xf32>, vector<2x16x16xf32> -> vector<2x16x16xf32>
    "tpu.trace_stop"() : () -> ()
    %cst_34 = arith.constant 2.500000e-01 : f32
    %81 = vector.broadcast %cst_34 : f32 to vector<2x16x16xf32>
    %82 = arith.mulf %80, %81 : vector<2x16x16xf32>
    %83 = vector.broadcast %34 : vector<2x1x16xf32> to vector<2x16x16xf32>
    %84 = arith.addf %82, %83 : vector<2x16x16xf32>
    %cst_35 = arith.constant dense<0xFF800000> : vector<2x16xf32>
    %85 = vector.multi_reduction <maximumf>, %84, %cst_35 [2] : vector<2x16x16xf32> to vector<2x16xf32>
    %86 = vector.shape_cast %85 : vector<2x16xf32> to vector<2x16x1xf32>
    %87 = vector.broadcast %86 : vector<2x16x1xf32> to vector<2x16x16xf32>
    %88 = arith.subf %84, %87 : vector<2x16x16xf32>
    %89 = math.exp %88 : vector<2x16x16xf32>
    %cst_36 = arith.constant dense<0.000000e+00> : vector<2x16xf32>
    %90 = vector.multi_reduction <add>, %89, %cst_36 [2] : vector<2x16x16xf32> to vector<2x16xf32>
    %91 = vector.shape_cast %90 : vector<2x16xf32> to vector<2x16x1xf32>
    %92 = vector.broadcast %91 : vector<2x16x1xf32> to vector<2x16x16xf32>
    %93 = arith.divf %89, %92 : vector<2x16x16xf32>
    %94 = vector.extract_strided_slice %59 {offsets = [0, 0, 16], sizes = [2, 16, 16], strides = [1, 1, 1]} : vector<2x16x32xf32> to vector<2x16x16xf32>
    "tpu.trace_start"() <{level = 10 : i32, message = "bqk,bkd->bqd"}> : () -> ()
    %cst_37 = arith.constant dense<0.000000e+00> : vector<2x16x16xf32>
    %95 = tpu.matmul %93, %94, %cst_37 {dimension_numbers = #tpu.dot_dimension_numbers<[2], [1], [1], [2], [0, 0, 0, 1, 1, 2], [0], [0]>} : vector<2x16x16xf32>, vector<2x16x16xf32>, vector<2x16x16xf32> -> vector<2x16x16xf32>
    "tpu.trace_stop"() : () -> ()
    %96 = tpu.concatenate %77, %95 in 2 : vector<2x16x16xf32>, vector<2x16x16xf32> -> vector<2x16x32xf32>
    %97 = vector.shape_cast %96 : vector<2x16x32xf32> to vector<32x32xf32>
    %c0_38 = arith.constant 0 : index
    %c0_39 = arith.constant 0 : index
    %c0_40 = arith.constant 0 : index
    %98 = vector.load %arg10[%c0_38, %c0_39, %c0_40] : memref<1x32x32xf32, #tpu.memory_space<vmem>>, vector<1x32x32xf32>
    %99 = vector.shape_cast %98 : vector<1x32x32xf32> to vector<32x32xf32>
    %cst_41 = arith.constant dense<0.000000e+00> : vector<32x32xf32>
    %100 = tpu.matmul %97, %99, %cst_41 {dimension_numbers = #tpu.dot_dimension_numbers<[1], [0], [0], [1], [0, 0, 1, 1], [], []>} : vector<32x32xf32>, vector<32x32xf32>, vector<32x32xf32> -> vector<32x32xf32>
    %c0_42 = arith.constant 0 : index
    %c0_43 = arith.constant 0 : index
    %c0_44 = arith.constant 0 : index
    %101 = vector.load %arg11[%c0_42, %c0_43, %c0_44] : memref<1x1x32xf32, #tpu.memory_space<vmem>>, vector<1x1x32xf32>
    %102 = vector.shape_cast %101 : vector<1x1x32xf32> to vector<1x32xf32>
    %103 = vector.broadcast %102 : vector<1x32xf32> to vector<32x32xf32>
    %104 = arith.addf %100, %103 : vector<32x32xf32>
    %105 = arith.addf %104, %35 : vector<32x32xf32>
    %c0_45 = arith.constant 0 : index
    %c0_46 = arith.constant 0 : index
    %c0_47 = arith.constant 0 : index
    %106 = vector.load %arg12[%c0_45, %c0_46, %c0_47] : memref<1x1x32xf32, #tpu.memory_space<vmem>>, vector<1x1x32xf32>
    %107 = vector.shape_cast %106 : vector<1x1x32xf32> to vector<1x32xf32>
    %c0_48 = arith.constant 0 : index
    %c0_49 = arith.constant 0 : index
    %c0_50 = arith.constant 0 : index
    %108 = vector.load %arg13[%c0_48, %c0_49, %c0_50] : memref<1x1x32xf32, #tpu.memory_space<vmem>>, vector<1x1x32xf32>
    %109 = vector.shape_cast %108 : vector<1x1x32xf32> to vector<1x32xf32>
    %cst_51 = arith.constant dense<0.000000e+00> : vector<32xf32>
    %110 = vector.multi_reduction <add>, %105, %cst_51 [1] : vector<32x32xf32> to vector<32xf32>
    %111 = vector.shape_cast %110 : vector<32xf32> to vector<32x1xf32>
    %cst_52 = arith.constant 3.200000e+01 : f32
    %112 = vector.broadcast %cst_52 : f32 to vector<32x1xf32>
    %113 = arith.divf %111, %112 : vector<32x1xf32>
    %114 = vector.broadcast %113 : vector<32x1xf32> to vector<32x32xf32>
    %115 = arith.subf %105, %114 : vector<32x32xf32>
    %116 = arith.mulf %115, %115 : vector<32x32xf32>
    %cst_53 = arith.constant dense<0.000000e+00> : vector<32xf32>
    %117 = vector.multi_reduction <add>, %116, %cst_53 [1] : vector<32x32xf32> to vector<32xf32>
    %118 = vector.shape_cast %117 : vector<32xf32> to vector<32x1xf32>
    %cst_54 = arith.constant 3.200000e+01 : f32
    %119 = vector.broadcast %cst_54 : f32 to vector<32x1xf32>
    %120 = arith.divf %118, %119 : vector<32x1xf32>
    %121 = vector.broadcast %113 : vector<32x1xf32> to vector<32x32xf32>
    %122 = arith.subf %105, %121 : vector<32x32xf32>
    %cst_55 = arith.constant 9.99999974E-6 : f32
    %123 = vector.broadcast %cst_55 : f32 to vector<32x1xf32>
    %124 = arith.addf %120, %123 : vector<32x1xf32>
    %125 = math.rsqrt %124 : vector<32x1xf32>
    %126 = vector.broadcast %125 : vector<32x1xf32> to vector<32x32xf32>
    %127 = arith.mulf %122, %126 : vector<32x32xf32>
    %128 = vector.broadcast %107 : vector<1x32xf32> to vector<32x32xf32>
    %129 = arith.mulf %127, %128 : vector<32x32xf32>
    %130 = vector.broadcast %109 : vector<1x32xf32> to vector<32x32xf32>
    %131 = arith.addf %129, %130 : vector<32x32xf32>
    %132 = vector.broadcast %33 : vector<32x1xf32> to vector<32x32xf32>
    %133 = arith.mulf %131, %132 : vector<32x32xf32>
    %cst_56 = arith.constant 0.000000e+00 : f32
    %134 = vector.broadcast %cst_56 : f32 to vector<2x1x32xf32>
    %c0_57 = arith.constant 0 : index
    %c0_58 = arith.constant 0 : index
    %c0_59 = arith.constant 0 : index
    %135 = vector.load %arg22[%c0_57, %c0_58, %c0_59] : memref<2x18x32xf32, #tpu.memory_space<vmem>>, vector<2x1x32xf32>
    tpu.vector_store %arg22[%c0_57, %c0_58, %c0_59], %134 {strides = array<i32>} : memref<2x18x32xf32, #tpu.memory_space<vmem>>, vector<2x1x32xf32>,
    %c0_60 = arith.constant 0 : index
    %c17 = arith.constant 17 : index
    %c0_61 = arith.constant 0 : index
    %136 = vector.load %arg22[%c0_60, %c17, %c0_61] : memref<2x18x32xf32, #tpu.memory_space<vmem>>, vector<2x1x32xf32>
    tpu.vector_store %arg22[%c0_60, %c17, %c0_61], %134 {strides = array<i32>} : memref<2x18x32xf32, #tpu.memory_space<vmem>>, vector<2x1x32xf32>,
    %137 = vector.shape_cast %133 : vector<32x32xf32> to vector<2x16x32xf32>
    %c0_62 = arith.constant 0 : index
    %c1 = arith.constant 1 : index
    %c0_63 = arith.constant 0 : index
    %138 = vector.load %arg22[%c0_62, %c1, %c0_63] : memref<2x18x32xf32, #tpu.memory_space<vmem>>, vector<2x16x32xf32>
    tpu.vector_store %arg22[%c0_62, %c1, %c0_63], %137 {strides = array<i32>} : memref<2x18x32xf32, #tpu.memory_space<vmem>>, vector<2x16x32xf32>,
    %cst_64 = arith.constant 0.000000e+00 : f32
    %139 = vector.broadcast %cst_64 : f32 to vector<32x64xf32>
    %c0_65 = arith.constant 0 : index
    %c0_66 = arith.constant 0 : index
    %c0_67 = arith.constant 0 : index
    %140 = vector.load %arg22[%c0_65, %c0_66, %c0_67] : memref<2x18x32xf32, #tpu.memory_space<vmem>>, vector<2x16x32xf32>
    %141 = vector.shape_cast %140 : vector<2x16x32xf32> to vector<32x32xf32>
    %c0_68 = arith.constant 0 : index
    %c0_69 = arith.constant 0 : index
    %c0_70 = arith.constant 0 : index
    %c0_71 = arith.constant 0 : index
    %142 = vector.load %arg14[%c0_68, %c0_69, %c0_70, %c0_71] : memref<1x3x32x64xf32, #tpu.memory_space<vmem>>, vector<1x1x32x64xf32>
    %143 = vector.shape_cast %142 : vector<1x1x32x64xf32> to vector<32x64xf32>
    %cst_72 = arith.constant dense<0.000000e+00> : vector<32x64xf32>
    %144 = tpu.matmul %141, %143, %cst_72 {dimension_numbers = #tpu.dot_dimension_numbers<[1], [0], [0], [1], [0, 0, 1, 1], [], []>} : vector<32x32xf32>, vector<32x64xf32>, vector<32x64xf32> -> vector<32x64xf32>
    %145 = arith.addf %139, %144 : vector<32x64xf32>
    %c0_73 = arith.constant 0 : index
    %c1_74 = arith.constant 1 : index
    %c0_75 = arith.constant 0 : index
    %146 = vector.load %arg22[%c0_73, %c1_74, %c0_75] : memref<2x18x32xf32, #tpu.memory_space<vmem>>, vector<2x16x32xf32>
    %147 = vector.shape_cast %146 : vector<2x16x32xf32> to vector<32x32xf32>
    %c0_76 = arith.constant 0 : index
    %c1_77 = arith.constant 1 : index
    %c0_78 = arith.constant 0 : index
    %c0_79 = arith.constant 0 : index
    %148 = vector.load %arg14[%c0_76, %c1_77, %c0_78, %c0_79] : memref<1x3x32x64xf32, #tpu.memory_space<vmem>>, vector<1x1x32x64xf32>
    %149 = vector.shape_cast %148 : vector<1x1x32x64xf32> to vector<32x64xf32>
    %cst_80 = arith.constant dense<0.000000e+00> : vector<32x64xf32>
    %150 = tpu.matmul %147, %149, %cst_80 {dimension_numbers = #tpu.dot_dimension_numbers<[1], [0], [0], [1], [0, 0, 1, 1], [], []>} : vector<32x32xf32>, vector<32x64xf32>, vector<32x64xf32> -> vector<32x64xf32>
    %151 = arith.addf %145, %150 : vector<32x64xf32>
    %c0_81 = arith.constant 0 : index
    %c2 = arith.constant 2 : index
    %c0_82 = arith.constant 0 : index
    %152 = vector.load %arg22[%c0_81, %c2, %c0_82] : memref<2x18x32xf32, #tpu.memory_space<vmem>>, vector<2x16x32xf32>
    %153 = vector.shape_cast %152 : vector<2x16x32xf32> to vector<32x32xf32>
    %c0_83 = arith.constant 0 : index
    %c2_84 = arith.constant 2 : index
    %c0_85 = arith.constant 0 : index
    %c0_86 = arith.constant 0 : index
    %154 = vector.load %arg14[%c0_83, %c2_84, %c0_85, %c0_86] : memref<1x3x32x64xf32, #tpu.memory_space<vmem>>, vector<1x1x32x64xf32>
    %155 = vector.shape_cast %154 : vector<1x1x32x64xf32> to vector<32x64xf32>
    %cst_87 = arith.constant dense<0.000000e+00> : vector<32x64xf32>
    %156 = tpu.matmul %153, %155, %cst_87 {dimension_numbers = #tpu.dot_dimension_numbers<[1], [0], [0], [1], [0, 0, 1, 1], [], []>} : vector<32x32xf32>, vector<32x64xf32>, vector<32x64xf32> -> vector<32x64xf32>
    %157 = arith.addf %151, %156 : vector<32x64xf32>
    %c0_88 = arith.constant 0 : index
    %c0_89 = arith.constant 0 : index
    %c0_90 = arith.constant 0 : index
    %158 = vector.load %arg15[%c0_88, %c0_89, %c0_90] : memref<1x1x64xf32, #tpu.memory_space<vmem>>, vector<1x1x64xf32>
    %159 = vector.shape_cast %158 : vector<1x1x64xf32> to vector<1x64xf32>
    %160 = vector.broadcast %159 : vector<1x64xf32> to vector<32x64xf32>
    %161 = arith.addf %157, %160 : vector<32x64xf32>
    %cst_91 = arith.constant 0.000000e+00 : f32
    %162 = vector.broadcast %cst_91 : f32 to vector<32x64xf32>
    %163 = arith.maximumf %161, %162 : vector<32x64xf32>
    %cst_92 = arith.constant 0.000000e+00 : f32
    %164 = vector.broadcast %cst_92 : f32 to vector<2x1x64xf32>
    %c0_93 = arith.constant 0 : index
    %c0_94 = arith.constant 0 : index
    %c0_95 = arith.constant 0 : index
    %165 = vector.load %arg23[%c0_93, %c0_94, %c0_95] : memref<2x18x64xf32, #tpu.memory_space<vmem>>, vector<2x1x64xf32>
    tpu.vector_store %arg23[%c0_93, %c0_94, %c0_95], %164 {strides = array<i32>} : memref<2x18x64xf32, #tpu.memory_space<vmem>>, vector<2x1x64xf32>,
    %c0_96 = arith.constant 0 : index
    %c17_97 = arith.constant 17 : index
    %c0_98 = arith.constant 0 : index
    %166 = vector.load %arg23[%c0_96, %c17_97, %c0_98] : memref<2x18x64xf32, #tpu.memory_space<vmem>>, vector<2x1x64xf32>
    tpu.vector_store %arg23[%c0_96, %c17_97, %c0_98], %164 {strides = array<i32>} : memref<2x18x64xf32, #tpu.memory_space<vmem>>, vector<2x1x64xf32>,
    %167 = vector.shape_cast %163 : vector<32x64xf32> to vector<2x16x64xf32>
    %c0_99 = arith.constant 0 : index
    %c1_100 = arith.constant 1 : index
    %c0_101 = arith.constant 0 : index
    %168 = vector.load %arg23[%c0_99, %c1_100, %c0_101] : memref<2x18x64xf32, #tpu.memory_space<vmem>>, vector<2x16x64xf32>
    tpu.vector_store %arg23[%c0_99, %c1_100, %c0_101], %167 {strides = array<i32>} : memref<2x18x64xf32, #tpu.memory_space<vmem>>, vector<2x16x64xf32>,
    %cst_102 = arith.constant 0.000000e+00 : f32
    %169 = vector.broadcast %cst_102 : f32 to vector<32x32xf32>
    %c0_103 = arith.constant 0 : index
    %c0_104 = arith.constant 0 : index
    %c0_105 = arith.constant 0 : index
    %170 = vector.load %arg23[%c0_103, %c0_104, %c0_105] : memref<2x18x64xf32, #tpu.memory_space<vmem>>, vector<2x16x64xf32>
    %171 = vector.shape_cast %170 : vector<2x16x64xf32> to vector<32x64xf32>
    %c0_106 = arith.constant 0 : index
    %c0_107 = arith.constant 0 : index
    %c0_108 = arith.constant 0 : index
    %c0_109 = arith.constant 0 : index
    %172 = vector.load %arg16[%c0_106, %c0_107, %c0_108, %c0_109] : memref<1x3x64x32xf32, #tpu.memory_space<vmem>>, vector<1x1x64x32xf32>
    %173 = vector.shape_cast %172 : vector<1x1x64x32xf32> to vector<64x32xf32>
    %cst_110 = arith.constant dense<0.000000e+00> : vector<32x32xf32>
    %174 = tpu.matmul %171, %173, %cst_110 {dimension_numbers = #tpu.dot_dimension_numbers<[1], [0], [0], [1], [0, 0, 1, 1], [], []>} : vector<32x64xf32>, vector<64x32xf32>, vector<32x32xf32> -> vector<32x32xf32>
    %175 = arith.addf %169, %174 : vector<32x32xf32>
    %c0_111 = arith.constant 0 : index
    %c1_112 = arith.constant 1 : index
    %c0_113 = arith.constant 0 : index
    %176 = vector.load %arg23[%c0_111, %c1_112, %c0_113] : memref<2x18x64xf32, #tpu.memory_space<vmem>>, vector<2x16x64xf32>
    %177 = vector.shape_cast %176 : vector<2x16x64xf32> to vector<32x64xf32>
    %c0_114 = arith.constant 0 : index
    %c1_115 = arith.constant 1 : index
    %c0_116 = arith.constant 0 : index
    %c0_117 = arith.constant 0 : index
    %178 = vector.load %arg16[%c0_114, %c1_115, %c0_116, %c0_117] : memref<1x3x64x32xf32, #tpu.memory_space<vmem>>, vector<1x1x64x32xf32>
    %179 = vector.shape_cast %178 : vector<1x1x64x32xf32> to vector<64x32xf32>
    %cst_118 = arith.constant dense<0.000000e+00> : vector<32x32xf32>
    %180 = tpu.matmul %177, %179, %cst_118 {dimension_numbers = #tpu.dot_dimension_numbers<[1], [0], [0], [1], [0, 0, 1, 1], [], []>} : vector<32x64xf32>, vector<64x32xf32>, vector<32x32xf32> -> vector<32x32xf32>
    %181 = arith.addf %175, %180 : vector<32x32xf32>
    %c0_119 = arith.constant 0 : index
    %c2_120 = arith.constant 2 : index
    %c0_121 = arith.constant 0 : index
    %182 = vector.load %arg23[%c0_119, %c2_120, %c0_121] : memref<2x18x64xf32, #tpu.memory_space<vmem>>, vector<2x16x64xf32>
    %183 = vector.shape_cast %182 : vector<2x16x64xf32> to vector<32x64xf32>
    %c0_122 = arith.constant 0 : index
    %c2_123 = arith.constant 2 : index
    %c0_124 = arith.constant 0 : index
    %c0_125 = arith.constant 0 : index
    %184 = vector.load %arg16[%c0_122, %c2_123, %c0_124, %c0_125] : memref<1x3x64x32xf32, #tpu.memory_space<vmem>>, vector<1x1x64x32xf32>
    %185 = vector.shape_cast %184 : vector<1x1x64x32xf32> to vector<64x32xf32>
    %cst_126 = arith.constant dense<0.000000e+00> : vector<32x32xf32>
    %186 = tpu.matmul %183, %185, %cst_126 {dimension_numbers = #tpu.dot_dimension_numbers<[1], [0], [0], [1], [0, 0, 1, 1], [], []>} : vector<32x64xf32>, vector<64x32xf32>, vector<32x32xf32> -> vector<32x32xf32>
    %187 = arith.addf %181, %186 : vector<32x32xf32>
    %c0_127 = arith.constant 0 : index
    %c0_128 = arith.constant 0 : index
    %c0_129 = arith.constant 0 : index
    %188 = vector.load %arg17[%c0_127, %c0_128, %c0_129] : memref<1x1x32xf32, #tpu.memory_space<vmem>>, vector<1x1x32xf32>
    %189 = vector.shape_cast %188 : vector<1x1x32xf32> to vector<1x32xf32>
    %190 = vector.broadcast %189 : vector<1x32xf32> to vector<32x32xf32>
    %191 = arith.addf %187, %190 : vector<32x32xf32>
    %192 = arith.addf %191, %133 : vector<32x32xf32>
    %c0_130 = arith.constant 0 : index
    %c0_131 = arith.constant 0 : index
    %c0_132 = arith.constant 0 : index
    %193 = vector.load %arg18[%c0_130, %c0_131, %c0_132] : memref<1x1x32xf32, #tpu.memory_space<vmem>>, vector<1x1x32xf32>
    %194 = vector.shape_cast %193 : vector<1x1x32xf32> to vector<1x32xf32>
    %c0_133 = arith.constant 0 : index
    %c0_134 = arith.constant 0 : index
    %c0_135 = arith.constant 0 : index
    %195 = vector.load %arg19[%c0_133, %c0_134, %c0_135] : memref<1x1x32xf32, #tpu.memory_space<vmem>>, vector<1x1x32xf32>
    %196 = vector.shape_cast %195 : vector<1x1x32xf32> to vector<1x32xf32>
    %cst_136 = arith.constant dense<0.000000e+00> : vector<32xf32>
    %197 = vector.multi_reduction <add>, %192, %cst_136 [1] : vector<32x32xf32> to vector<32xf32>
    %198 = vector.shape_cast %197 : vector<32xf32> to vector<32x1xf32>
    %cst_137 = arith.constant 3.200000e+01 : f32
    %199 = vector.broadcast %cst_137 : f32 to vector<32x1xf32>
    %200 = arith.divf %198, %199 : vector<32x1xf32>
    %201 = vector.broadcast %200 : vector<32x1xf32> to vector<32x32xf32>
    %202 = arith.subf %192, %201 : vector<32x32xf32>
    %203 = arith.mulf %202, %202 : vector<32x32xf32>
    %cst_138 = arith.constant dense<0.000000e+00> : vector<32xf32>
    %204 = vector.multi_reduction <add>, %203, %cst_138 [1] : vector<32x32xf32> to vector<32xf32>
    %205 = vector.shape_cast %204 : vector<32xf32> to vector<32x1xf32>
    %cst_139 = arith.constant 3.200000e+01 : f32
    %206 = vector.broadcast %cst_139 : f32 to vector<32x1xf32>
    %207 = arith.divf %205, %206 : vector<32x1xf32>
    %208 = vector.broadcast %200 : vector<32x1xf32> to vector<32x32xf32>
    %209 = arith.subf %192, %208 : vector<32x32xf32>
    %cst_140 = arith.constant 9.99999974E-6 : f32
    %210 = vector.broadcast %cst_140 : f32 to vector<32x1xf32>
    %211 = arith.addf %207, %210 : vector<32x1xf32>
    %212 = math.rsqrt %211 : vector<32x1xf32>
    %213 = vector.broadcast %212 : vector<32x1xf32> to vector<32x32xf32>
    %214 = arith.mulf %209, %213 : vector<32x32xf32>
    %215 = vector.broadcast %194 : vector<1x32xf32> to vector<32x32xf32>
    %216 = arith.mulf %214, %215 : vector<32x32xf32>
    %217 = vector.broadcast %196 : vector<1x32xf32> to vector<32x32xf32>
    %218 = arith.addf %216, %217 : vector<32x32xf32>
    %219 = vector.broadcast %33 : vector<32x1xf32> to vector<32x32xf32>
    %220 = arith.mulf %218, %219 : vector<32x32xf32>
    %c0_141 = arith.constant 0 : index
    %c0_142 = arith.constant 0 : index
    %221 = vector.load %arg21[%c0_141, %c0_142] : memref<32x32xf32, #tpu.memory_space<vmem>>, vector<32x32xf32>
    tpu.vector_store %arg21[%c0_141, %c0_142], %220 {strides = array<i32>} : memref<32x32xf32, #tpu.memory_space<vmem>>, vector<32x32xf32>,
    %c1_i32_143 = arith.constant 1 : i32
    %222 = arith.cmpi eq, %arg1, %c1_i32_143 : i32
    %223 = arith.extui %222 : i1 to i32
    %c0_i32_144 = arith.constant 0 : i32
    %224 = arith.cmpi ne, %223, %c0_i32_144 : i32
    scf.if %224 {
      %225 = vector.shape_cast %220 : vector<32x32xf32> to vector<2x16x32xf32>
      %c0_145 = arith.constant 0 : index
      %c0_146 = arith.constant 0 : index
      %c0_147 = arith.constant 0 : index
      %226 = vector.load %arg20[%c0_145, %c0_146, %c0_147] : memref<2x16x32xf32, #tpu.memory_space<vmem>>, vector<2x16x32xf32>
      tpu.vector_store %arg20[%c0_145, %c0_146, %c0_147], %225 {strides = array<i32>} : memref<2x16x32xf32, #tpu.memory_space<vmem>>, vector<2x16x32xf32>,
    } else {
    }
    return
  }
  func.func @transform_0(%arg0: i32, %arg1: i32, %arg2: memref<2xi32, #tpu.memory_space<smem>>) -> (i32, i32, i32) {
    %c0_i32 = arith.constant 0 : i32
    %c0_i32_0 = arith.constant 0 : i32
    %c0_i32_1 = arith.constant 0 : i32
    return %arg0, %c0_i32, %c0_i32_0 : i32, i32, i32
  }
  func.func @transform_1(%arg0: i32, %arg1: i32, %arg2: memref<2xi32, #tpu.memory_space<smem>>) -> (i32, i32, i32) {
    %c0_i32 = arith.constant 0 : i32
    %c0_i32_0 = arith.constant 0 : i32
    %c0_i32_1 = arith.constant 0 : i32
    return %arg1, %c0_i32, %c0_i32_0 : i32, i32, i32
  }
  func.func @transform_2(%arg0: i32, %arg1: i32, %arg2: memref<2xi32, #tpu.memory_space<smem>>) -> (i32, i32, i32) {
    %c0_i32 = arith.constant 0 : i32
    %c0_i32_0 = arith.constant 0 : i32
    %c0_i32_1 = arith.constant 0 : i32
    return %arg1, %c0_i32, %c0_i32_0 : i32, i32, i32
  }
  func.func @transform_3(%arg0: i32, %arg1: i32, %arg2: memref<2xi32, #tpu.memory_space<smem>>) -> (i32, i32, i32) {
    %c0_i32 = arith.constant 0 : i32
    %c0_i32_0 = arith.constant 0 : i32
    %c0_i32_1 = arith.constant 0 : i32
    return %arg1, %c0_i32, %c0_i32_0 : i32, i32, i32
  }
  func.func @transform_4(%arg0: i32, %arg1: i32, %arg2: memref<2xi32, #tpu.memory_space<smem>>) -> (i32, i32, i32) {
    %c0_i32 = arith.constant 0 : i32
    %c0_i32_0 = arith.constant 0 : i32
    %c0_i32_1 = arith.constant 0 : i32
    return %arg1, %c0_i32, %c0_i32_0 : i32, i32, i32
  }
  func.func @transform_5(%arg0: i32, %arg1: i32, %arg2: memref<2xi32, #tpu.memory_space<smem>>) -> (i32, i32, i32) {
    %c0_i32 = arith.constant 0 : i32
    %c0_i32_0 = arith.constant 0 : i32
    %c0_i32_1 = arith.constant 0 : i32
    return %arg1, %c0_i32, %c0_i32_0 : i32, i32, i32
  }
  func.func @transform_6(%arg0: i32, %arg1: i32, %arg2: memref<2xi32, #tpu.memory_space<smem>>) -> (i32, i32, i32) {
    %c0_i32 = arith.constant 0 : i32
    %c0_i32_0 = arith.constant 0 : i32
    %c0_i32_1 = arith.constant 0 : i32
    return %arg1, %c0_i32, %c0_i32_0 : i32, i32, i32
  }
  func.func @transform_7(%arg0: i32, %arg1: i32, %arg2: memref<2xi32, #tpu.memory_space<smem>>) -> (i32, i32, i32) {
    %c0_i32 = arith.constant 0 : i32
    %c0_i32_0 = arith.constant 0 : i32
    %c0_i32_1 = arith.constant 0 : i32
    return %arg1, %c0_i32, %c0_i32_0 : i32, i32, i32
  }
  func.func @transform_8(%arg0: i32, %arg1: i32, %arg2: memref<2xi32, #tpu.memory_space<smem>>) -> (i32, i32, i32) {
    %c0_i32 = arith.constant 0 : i32
    %c0_i32_0 = arith.constant 0 : i32
    %c0_i32_1 = arith.constant 0 : i32
    return %arg1, %c0_i32, %c0_i32_0 : i32, i32, i32
  }
  func.func @transform_9(%arg0: i32, %arg1: i32, %arg2: memref<2xi32, #tpu.memory_space<smem>>) -> (i32, i32, i32) {
    %c0_i32 = arith.constant 0 : i32
    %c0_i32_0 = arith.constant 0 : i32
    %c0_i32_1 = arith.constant 0 : i32
    return %arg1, %c0_i32, %c0_i32_0 : i32, i32, i32
  }
  func.func @transform_10(%arg0: i32, %arg1: i32, %arg2: memref<2xi32, #tpu.memory_space<smem>>) -> (i32, i32, i32) {
    %c0_i32 = arith.constant 0 : i32
    %c0_i32_0 = arith.constant 0 : i32
    %c0_i32_1 = arith.constant 0 : i32
    return %arg1, %c0_i32, %c0_i32_0 : i32, i32, i32
  }
  func.func @transform_11(%arg0: i32, %arg1: i32, %arg2: memref<2xi32, #tpu.memory_space<smem>>) -> (i32, i32, i32, i32) {
    %c0_i32 = arith.constant 0 : i32
    %c0_i32_0 = arith.constant 0 : i32
    %c0_i32_1 = arith.constant 0 : i32
    %c0_i32_2 = arith.constant 0 : i32
    return %arg1, %c0_i32, %c0_i32_0, %c0_i32_1 : i32, i32, i32, i32
  }
  func.func @transform_12(%arg0: i32, %arg1: i32, %arg2: memref<2xi32, #tpu.memory_space<smem>>) -> (i32, i32, i32) {
    %c0_i32 = arith.constant 0 : i32
    %c0_i32_0 = arith.constant 0 : i32
    %c0_i32_1 = arith.constant 0 : i32
    return %arg1, %c0_i32, %c0_i32_0 : i32, i32, i32
  }
  func.func @transform_13(%arg0: i32, %arg1: i32, %arg2: memref<2xi32, #tpu.memory_space<smem>>) -> (i32, i32, i32, i32) {
    %c0_i32 = arith.constant 0 : i32
    %c0_i32_0 = arith.constant 0 : i32
    %c0_i32_1 = arith.constant 0 : i32
    %c0_i32_2 = arith.constant 0 : i32
    return %arg1, %c0_i32, %c0_i32_0, %c0_i32_1 : i32, i32, i32, i32
  }
  func.func @transform_14(%arg0: i32, %arg1: i32, %arg2: memref<2xi32, #tpu.memory_space<smem>>) -> (i32, i32, i32) {
    %c0_i32 = arith.constant 0 : i32
    %c0_i32_0 = arith.constant 0 : i32
    %c0_i32_1 = arith.constant 0 : i32
    return %arg1, %c0_i32, %c0_i32_0 : i32, i32, i32
  }
  func.func @transform_15(%arg0: i32, %arg1: i32, %arg2: memref<2xi32, #tpu.memory_space<smem>>) -> (i32, i32, i32) {
    %c0_i32 = arith.constant 0 : i32
    %c0_i32_0 = arith.constant 0 : i32
    %c0_i32_1 = arith.constant 0 : i32
    return %arg1, %c0_i32, %c0_i32_0 : i32, i32, i32
  }
  func.func @transform_16(%arg0: i32, %arg1: i32, %arg2: memref<2xi32, #tpu.memory_space<smem>>) -> (i32, i32, i32) {
    %c0_i32 = arith.constant 0 : i32
    %c0_i32_0 = arith.constant 0 : i32
    %c0_i32_1 = arith.constant 0 : i32
    return %arg1, %c0_i32, %c0_i32_0 : i32, i32, i32
  }
  func.func @transform_17(%arg0: i32, %arg1: i32, %arg2: memref<2xi32, #tpu.memory_space<smem>>) -> (i32, i32, i32) {
    %c0_i32 = arith.constant 0 : i32
    %c0_i32_0 = arith.constant 0 : i32
    %c0_i32_1 = arith.constant 0 : i32
    return %arg0, %c0_i32, %c0_i32_0 : i32, i32, i32
  }
}

</mosaic_0001>

<bundles_post_ra>
// kernel: tpu_custom_call.1
= control target key start
LH: loop header
LB: loop body
LE: loop exit
PB: predicated region body
PF: predicated region fallthrough
CT: control target
= control target key end

     0   :  { %s4752_s0 = inlined_call_operand.vmem [shape: s32[2], index: 0, kind: input, shape index: {}]   ;;  %s4753_s1 = inlined_call_operand.vmem [shape: f32[2,16,32], index: 1, kind: input, shape index: {}]   ;;  %s4754_s2 = inlined_call_operand.vmem [shape: f32[2,32,32], index: 2, kind: input, shape index: {}]   ;;  %s4755_s3 = inlined_call_operand.vmem [shape: f32[2,1,32], index: 3, kind: input, shape index: {}]   ;;  %s4756_s4 = inlined_call_operand.vmem [shape: f32[2,32,32], index: 4, kind: input, shape index: {}]   ;;  %s4757_s5 = inlined_call_operand.vmem [shape: f32[2,1,32], index: 5, kind: input, shape index: {}]   ;;  %s4758_s6 = inlined_call_operand.vmem [shape: f32[2,32,32], index: 6, kind: input, shape index: {}]   ;;  %s4759_s7 = inlined_call_operand.vmem [shape: f32[2,1,32], index: 7, kind: input, shape index: {}]   ;;  %s4760_s8 = inlined_call_operand.vmem [shape: f32[2,32,32], index: 8, kind: input, shape index: {}]   ;;  %s4761_s9 = inlined_call_operand.vmem [shape: f32[2,1,32], index: 9, kind: input, shape index: {}]   ;;  %s4762_s10 = inlined_call_operand.vmem [shape: f32[2,1,32], index: 10, kind: input, shape index: {}]   ;;  %s4763_s11 = inlined_call_operand.vmem [shape: f32[2,1,32], index: 11, kind: input, shape index: {}]   ;;  %s4764_s12 = inlined_call_operand.vmem [shape: f32[2,3,32,64], index: 12, kind: input, shape index: {}]   ;;  %s4765_s13 = inlined_call_operand.vmem [shape: f32[2,1,64], index: 13, kind: input, shape index: {}]   ;;  %s4766_s14 = inlined_call_operand.vmem [shape: f32[2,3,64,32], index: 14, kind: input, shape index: {}]   ;;  %s4767_s15 = inlined_call_operand.vmem [shape: f32[2,1,32], index: 15, kind: input, shape index: {}]   ;;  %s4768_s16 = inlined_call_operand.vmem [shape: f32[2,1,32], index: 16, kind: input, shape index: {}]   ;;  %s4769_s17 = inlined_call_operand.vmem [shape: f32[2,1,32], index: 17, kind: input, shape index: {}]   ;;  %s4770_s18 = inlined_call_operand.hbm [shape: f32[2,16,32], index: 18, kind: output, shape index: {}]  }
   0x1   :  { %4777 = sst [smem:[#allocation16_spill]] %s4752_s0 }
   0x2   :  { %4778 = sst [smem:[#allocation17_spill]] %s4753_s1  ;;  %s4787_s29 = sld [smem:[#allocation16_spill]] }
   0x3   :  { %4779 = sst [smem:[#allocation18_spill]] %s4754_s2 }
   0x4   :  { %4780 = sst [smem:[#allocation19_spill]] %s4755_s3 }
   0x5   :  { %4781 = sst [smem:[#allocation20_spill]] %s4756_s4 }
   0x6   :  { %4782 = sst [smem:[#allocation21_spill]] %s4757_s5 }
   0x7   :  { %4783 = sst [smem:[#allocation22_spill]] %s4758_s6 }
   0x8   :  { %4784 = sst [smem:[#allocation23_spill]] %s4760_s8 }
   0x9   :  { %4785 = sst [smem:[#allocation24_spill]] %s4764_s12  ;;  %s23_s12 = sshll.u32 %s4787_s29, 4  ;;  %s24_s12 = int_to_ptr.vmem [resolvable:$true] %s23_s12 }
   0xa   :  { %4786 = sst [smem:[#allocation25_spill]] %s4770_s18  ;;  %s3984_s30 = scalar_lea.vmem %s24_s12, 16 }
   0xb   :  { %p3985_p0 = scmp.ne.s32.totalorder %s24_s12, %s3984_s30  ;;  %p3989_p1 = scmp.lt.s32.totalorder %s24_s12, %s24_s12 }
   0xc   :  { %p3990_p2 = scmp.lt.s32.totalorder %s3984_s30, %s3984_s30 }
   0xe   :  { %p3991_p3 = por %p3990_p2, %p3989_p1 }
  0x10   :  { %p3992_p4 = pnand %p3991_p3, %p3985_p0 }
  0x12   :  { %3995 = shalt.err (!%p3992_p4)  }
  0x13   :  { %s4052_s0 = smov [#allocation6]  }
  0x14   :  { %26 = dma.vmem_to_smem %s24_s12, 16, %s4052_s0, [#allocation5] }
  0x15   :  { %4034 = dma.done.wait [#allocation5], 16 }
  0x16   :  { %4035 = vsyncadd [#allocation5], 4294967280 }
  0x17   :  { %28 = sfence }
  0x18   :  { %29 = vsyncpa [#allocation8], 0  ;;  %s4159_s19 = smov 0   ;;  %s4161_s1 = smov 0  }
  0x19   :  { %s4163_s20 = smov 0  }
  0x1a LB: > { %4788 = sst [smem:[#allocation11_spill]] %s4042_s19  ;;  %s44_s21 = sadd.s32 1, %s4046_s1  ;;  %s4050_s20 = sphi %s4163_s20, %s35_s20   ;;  %s4046_s1 = sphi %s4161_s1, %s4821_s1   ;;  %s4042_s19 = sphi %s4159_s19, %s4820_s19  }
  0x1b   : > { %4789 = sst [smem:[#allocation12_spill]] %s4046_s1  ;;  %p45_p5 = scmp.ge.s32.totalorder %s44_s21, 2 }
  0x1c   : > { %4790 = sst [smem:[#allocation13_spill]] %s4050_s20  ;;  %p3235_p6 = scmp.ge.s32.totalorder %s4050_s20, 1 }
  0x1d   : > { %p649_p7 = scmp.lt.s32.totalorder %s4050_s20, 3  ;;  %s4823_s21 = smov (%p45_p5, %s44_s21), 0 }
  0x1e   : > { %4791 = sst [smem:[#allocation14_spill]] %s4823_s21 }
  0x1f   : > { %p650_p8 = pnand %p3235_p6, %p649_p7 }
  0x21   : > { %653 = sbr.rel (%p650_p8) target bundleno = 3103 (0xc1f), region = 88 }
  0x28   : > { %p764_p9 = scmp.lt.s32.totalorder %s4042_s19, 1  ;;  %s4793_s28 = sld [smem:[#allocation18_spill]] }
  0x29   : > { %s4794_s4 = sld [smem:[#allocation20_spill]]  ;;  %s4796_s6 = sld [smem:[#allocation22_spill]] }
  0x2a   : > { %s4182_s22 = scalar_select %p764_p9, %s4042_s19, 1 }
  0x2b   : > { %s4797_s8 = sld [smem:[#allocation23_spill]] }
  0x2c   : > { %s3355_s2 = sshll.u32 %s4182_s22, 5  ;;  %s3863_s5 = smul.u32 96, %s4182_s22 }
  0x2d   : > { %s3864_s25 = smul.u32 192, %s4182_s22  ;;  %s817_s1 = scalar_lea.vmem %s4767_s15, %s4182_s22 }
  0x2e   : > { %s4192_s29 = scalar_lea.vmem %s4793_s28, %s3355_s2  ;;  %s820_s24 = scalar_lea.vmem %s4768_s16, %s4182_s22 }
  0x2f   : > { %s4197_s12 = scalar_lea.vmem %s4794_s4, %s3355_s2  ;;  %s4206_s23 = scalar_lea.vmem %s4796_s6, %s3355_s2 }
  0x30   : > { %s4247_s19 = scalar_lea.vmem %s4766_s14, %s3864_s25  ;;  %s823_s3 = scalar_lea.vmem %s4769_s17, %s4182_s22 }
  0x31   : > { %s4215_s30 = scalar_lea.vmem %s4797_s8, %s3355_s2  ;;  %s4799_s8 = sld [smem:[#allocation24_spill]] }
  0x32   : > { %4798 = sst [smem:[#allocation15_spill]] %s4215_s30  ;;  %s4800_s2 = sld [smem:[#allocation11_spill]] }
  0x37   : > { %s4238_s30 = scalar_lea.vmem %s4799_s8, %s3863_s5 }
  0x38   : > { %p3246_p10 = scmp.ne.s32.totalorder %s4800_s2, 0 }
  0x39   : > { %s4801_s28 = sld [smem:[#allocation17_spill]] (!%p3246_p10)  ;;  %vm833_vm0 = vcmask (!%p3246_p10), 261120  }
  0x3a   : > { %828 = sbr.rel (%p3246_p10) target bundleno = 66 (0x42), region = 92 }
  0x3f   : > { %v829_v0 = vld [vmem:[%s4801_s28] sm:$0xff] (!%p3246_p10)  ;;  %v830_v1 = vld [vmem:[%s4801_s28 + $0x8] sm:$0xff] (!%p3246_p10)  ;;  %v831_v2 = vld [vmem:[%s4801_s28 + $0x10] sm:$0xff] (!%p3246_p10) }
  0x40   : > { %834 = vst.msk [vmem:[#allocation2] sm:$0xff] (!%p3246_p10), %vm833_vm0, %v829_v0  ;;  %835 = vst.msk [vmem:[#allocation2 + $0x8] sm:$0xff] (!%p3246_p10), %vm833_vm0, %v830_v1  ;;  %v832_v3 = vld [vmem:[%s4801_s28 + $0x18] sm:$0xff] (!%p3246_p10) }
  0x41   : > { %836 = vst.msk [vmem:[#allocation2 + $0x10] sm:$0xff] %vm833_vm0, %v831_v2  ;;  %837 = vst.msk [vmem:[#allocation2 + $0x18] sm:$0xff] %vm833_vm0, %v832_v3 }
  0x42 PF: > { %v978_v4 = vld [vmem:[%s4197_s12] sm:$0xff]  ;;  %v979_v5 = vld [vmem:[%s4197_s12 + $0x8] sm:$0xff]  ;;  %v980_v6 = vld [vmem:[%s4197_s12 + $0x10] sm:$0xff]  ;;  %vm880_vm1 = vcmask 261120   ;;  %s4802_s21 = sld [smem:[#allocation21_spill]]  ;;  %vm1170_vm2 = vcmask 130048   ;;  %s4808_s18 = scalar_lea.vmem %s4759_s7, %s4182_s22  ;;  %v840_v62 = vlaneseq }
  0x43   : > { %v3711_v7 = vpack.c.bf16 %v979_v5, %v978_v4  ;;  %v981_v8 = vld [vmem:[%s4197_s12 + $0x18] sm:$0xff]  ;;  %v869_v10 = vld [vmem:[%s4192_s29] sm:$0xff]  ;;  %v870_v12 = vld [vmem:[%s4192_s29 + $0x8] sm:$0xff]  ;;  %s4804_s2 = sld [smem:[#allocation19_spill]]  ;;  %s839_s25 = sld [smem:[#allocation6]]  ;;  %vm2210_vm10 = vcmask 253952  }
  0x44   : > { %v3715_v11 = vpack.c.bf16 %v981_v8, %v980_v6  ;;  %v3703_v13 = vpack.c.bf16 %v870_v12, %v869_v10  ;;  %v871_v14 = vld [vmem:[%s4192_s29 + $0x10] sm:$0xff]  ;;  %v872_v15 = vld [vmem:[%s4192_s29 + $0x18] sm:$0xff]  ;;  %v1074_v17 = vld [vmem:[%s4206_s23] sm:$0xff]  ;;  %s3249_s0 = sld [smem:[#allocation6 + $0x1]]  ;;  %v851_v63 = vand.u32 127, %v840_v62  ;;  %v4396_v1 = vshrl.u32 %v840_v62, 7  ;;  %s4812_s4 = scalar_lea.vmem %s4763_s11, %s4182_s22 }
  0x45   : > { %3712 = vmatprep.subr.bf16.mxu1 %v3711_v7  ;;  %v3707_v16 = vpack.c.bf16 %v872_v15, %v871_v14  ;;  %v1075_v18 = vld [vmem:[%s4206_s23 + $0x8] sm:$0xff]  ;;  %v1076_v23 = vld [vmem:[%s4206_s23 + $0x10] sm:$0xff]  ;;  %v1077_v24 = vld [vmem:[%s4206_s23 + $0x18] sm:$0xff]  ;;  %v4053_v4 = vmov -1e+09   ;;  %s4054_s6 = smov 112  }
  0x46   : > { %3714 = vmatpush3.bf16.msra.mxu1 %v3711_v7  ;;  %3704 = vmatprep.subr.bf16.mxu0 %v3703_v13  ;;  %v3719_v19 = vpack.c.bf16 %v1075_v18, %v1074_v17  ;;  %v3723_v25 = vpack.c.bf16 %v1077_v24, %v1076_v23  ;;  %vm4330_vm3 = vmpackc.low %vm1170_vm2, %vm1170_vm2  ;;  %v3262_v49 = vld [vmem:[%s4808_s18] ss:$0 sm:$0xff]  ;;  %v1351_v3 = vsub.s32 0, %v4396_v1  ;;  %s4809_s27 = sld [smem:[#allocation15_spill]]  ;;  %s4055_s12 = smov 16   ;;  %vm2555_vm11 = vcmask 516096  }
  0x47   : > { %3716 = vmatprep.subr.bf16.mxu1 %v3715_v11  ;;  %3706 = vmatpush3.bf16.msra.mxu0 %v3703_v13  ;;  %vm2560_vm12 = vcmask 523264  }
  0x48   : > { %v4274_v9 = vld [vmem:[#allocation2] sm:$0xff]  ;;  %3708 = vmatprep.subr.bf16.mxu0 %v3707_v16  ;;  %v4286_v20 = vld [vmem:[#allocation2 + $0x8] sm:$0xff]  ;;  %v4288_v21 = vld [vmem:[#allocation2 + $0x10] sm:$0xff]  ;;  %s4803_s20 = scalar_lea.vmem %s4802_s21, %s4182_s22 }
  0x49   : > { %3505 = vmatprep.mubr.msk.f32.mxu1 %vm880_vm1, %v4274_v9  ;;  %3491 = vmatprep.mubr.msk.f32.mxu0 %vm880_vm1, %v4274_v9  ;;  %v4294_v22 = vld [vmem:[#allocation2 + $0x18] sm:$0xff]  ;;  %v3257_v26 = vld [vmem:[%s4803_s20] ss:$0 sm:$0xff]  ;;  %s4805_s5 = scalar_lea.vmem %s4804_s2, %s4182_s22  ;;  %v4394_v0 = vstv %s839_s25  ;;  %s4810_s20 = scalar_lea.vmem %s4761_s9, %s4182_s22 }
  0x4a   : > { %3718 = vmatpush3.bf16.msra.mxu1 %v3715_v11  ;;  %v3252_v30 = vld [vmem:[%s4805_s5] ss:$0 sm:$0xff]  ;;  %vm852_vm4 = vcmp.lt.s32.totalorder %v851_v63, %v4394_v0  ;;  %v4399_v2 = vstv %s3249_s0  ;;  %vm844_vm8 = vcmp.lt.s32.totalorder %v4396_v1, %v4394_v0  ;;  %s4811_s2 = scalar_lea.vmem %s4762_s10, %s4182_s22  ;;  %s4813_s25 = scalar_lea.vmem %s4765_s13, %s4182_s22 }
  0x4b   : > { %3710 = vmatpush3.bf16.msra.mxu0 %v3707_v16  ;;  %v853_v5 = vsel %vm852_vm4, 0.0, %v4053_v4  ;;  %vm863_vm5 = vcmp.lt.s32.totalorder %v851_v63, %v4399_v2  ;;  %vm857_vm6 = vcmp.lt.s32.totalorder %v4396_v1, %v4399_v2 }
  0x4c   : > { %3720 = vmatprep.subr.bf16.mxu0 %v3719_v19  ;;  %v4403_v7 = vrot.slane %v853_v5, %v1351_v3  ;;  %v864_v10 = vsel %vm863_vm5, 0.0, %v4053_v4 }
  0x4d   : > { %3506 = vmatmul.mubr.msk.f32.vlgmr.msra.gmra.mrb[0].mxu1 %vm880_vm1, %v4286_v20  ;;  %v4406_v15 = vrot.slane %v864_v10, %v1351_v3 }
  0x4e   : > { %3508 = vmatprep.mubr.msk.f32.mxu1 %vm880_vm1, %v4288_v21  ;;  %3492 = vmatmul.mubr.msk.f32.vlgmr.msra.gmra.mrb[0].mxu0 %vm880_vm1, %v4286_v20 }
  0x4f   : > { %3494 = vmatprep.mubr.msk.f32.mxu0 %vm880_vm1, %v4288_v21  ;;  %3722 = vmatpush3.bf16.msra.mxu0 %v3719_v19 }
  0x50   : > { %3724 = vmatprep.subr.bf16.mxu0 %v3723_v25 }
  0x51   : > { %3509 = vmatmul.mubr.msk.f32.gmra.mrb[2].mxu1 %vm880_vm1, %v4294_v22 }
  0x52   : > { %3495 = vmatmul.mubr.msk.f32.gmra.mrb[2].mxu0 %vm880_vm1, %v4294_v22 }
  0x53   : > { %3519 = vmatprep.mubr.msk.f32.mxu0 %vm880_vm1, %v4274_v9  ;;  %3726 = vmatpush3.bf16.msra.mxu0 %v3723_v25 }
  0x56   : > { %3520 = vmatmul.mubr.msk.f32.vlgmr.msra.gmra.mrb[4].mxu0 %vm880_vm1, %v4286_v20 }
  0x57   : > { %3522 = vmatprep.mubr.msk.f32.mxu0 %vm880_vm1, %v4288_v21 }
  0x5a   : > { %3523 = vmatmul.mubr.msk.f32.gmra.mrb[6].mxu0 %vm880_vm1, %v4294_v22 }
 0x120   : > { %v3507_v27 = vpop.f32.mrb[0].mxu1 }
 0x121   : > { %v4319_v28 = vadd.f32 %v3507_v27, %v3257_v26  ;;  %v1055_v29 = vpop.f32.mrb[1].mxu1  ;;  %v3493_v32 = vpop.f32.mrb[0].mxu0 }
 0x122   : > { %v4326_v31 = vadd.f32 %v3257_v26, %v1055_v29  ;;  %v959_v34 = vpop.f32.mrb[1].mxu0  ;;  %v4362_v47 = vadd.f32 %v3493_v32, %v3252_v30 }
 0x123   : > { %v4338_v38 = vadd.f32 %v3252_v30, %v959_v34 }
 0x124   : > { %v3904_v35 = vpack.i.bf16 %v4319_v28, %v4326_v31  ;;  %v3727_v36 = vpack.c.bf16 %v4319_v28, %v4326_v31  ;;  %v3510_v37 = vpop.f32.mrb[2].mxu1 }
 0x125   : > { %v4340_v39 = vadd.f32 %v3510_v37, %v3257_v26  ;;  %v1065_v40 = vpop.f32.mrb[3].mxu1  ;;  %3529 = vmatprep.mubr.msk.f32.mxu1 %vm1170_vm2, %v4338_v38  ;;  %v3496_v42 = vpop.f32.mrb[2].mxu0 }
 0x126   : > { %v4342_v41 = vadd.f32 %v3257_v26, %v1065_v40  ;;  %3729 = vmatprep.subr.msk.bf16.mxu1 %vm4330_vm3, %v3727_v36  ;;  %v969_v43 = vpop.f32.mrb[3].mxu0  ;;  %v4364_v48 = vadd.f32 %v3496_v42, %v3252_v30 }
 0x127   : > { %3732 = vmatpush3.bf16.xpose.msk.msra.mxu1 %vm4330_vm3, %v3727_v36  ;;  %v4354_v46 = vadd.f32 %v3252_v30, %v969_v43 }
 0x128   : > { %v3909_v44 = vpack.i.bf16 %v4340_v39, %v4342_v41  ;;  %v3733_v45 = vpack.c.bf16 %v4340_v39, %v4342_v41 }
 0x129   : > { %3536 = vmatprep.mubr.msk.f32.mxu0 %vm1170_vm2, %v4354_v46  ;;  %v3521_v50 = vpop.f32.mrb[4].mxu0 }
 0x12a   : > { %3735 = vmatprep.subr.msk.bf16.mxu0 %vm4330_vm3, %v3733_v45  ;;  %v4375_v51 = vadd.f32 %v3521_v50, %v3262_v49  ;;  %v1151_v52 = vpop.f32.mrb[5].mxu0 }
 0x12b   : > { %3738 = vmatpush3.bf16.xpose.msk.msra.mxu0 %vm4330_vm3, %v3733_v45  ;;  %v4377_v53 = vadd.f32 %v3262_v49, %v1151_v52 }
 0x12d   : > { %v3914_v54 = vpack.i.bf16 %v4375_v51, %v4377_v53  ;;  %v3739_v55 = vpack.c.bf16 %v4375_v51, %v4377_v53  ;;  %v3524_v56 = vpop.f32.mrb[6].mxu0 }
 0x12e   : > { %3530 = vmatmul.mubr.msk.f32.vlgmr.msra.gmra.mrb[4].mxu1 %vm1170_vm2, %v4362_v47  ;;  %v4383_v57 = vadd.f32 %v3524_v56, %v3262_v49  ;;  %v1161_v58 = vpop.f32.mrb[7].mxu0 }
 0x12f   : > { %3740 = vmatprep.subr.bf16.mxu1 %v3739_v55  ;;  %v4385_v59 = vadd.f32 %v3262_v49, %v1161_v58 }
 0x130   : > { %3742 = vmatpush3.bf16.msra.mxu1 %v3739_v55 }
 0x131   : > { %v3919_v60 = vpack.i.bf16 %v4383_v57, %v4385_v59  ;;  %v4391_v61 = vpack.c.bf16 %v4383_v57, %v4385_v59 }
 0x132   : > { %3537 = vmatmul.mubr.msk.f32.vlgmr.msra.gmra.mrb[8].mxu0 %vm1170_vm2, %v4364_v48 }
 0x133   : > { %3744 = vmatprep.subr.bf16.mxu1 %v4391_v61 }
 0x201   : > { %v3531_v6 = vpop.f32.mrb[4].mxu1 }
 0x202   : > { %v1249_v8 = vpop.f32.mrb[5].mxu1  ;;  %v1346_v11 = vmul.f32 0.25, %v3531_v6 }
 0x203   : > { %v1345_v12 = vmul.f32 0.25, %v1249_v8 }
 0x204   : > { %v1358_v23 = vadd.f32 %v4403_v7, %v1346_v11 }
 0x205   : > { %v3538_v13 = vpop.f32.mrb[8].mxu0  ;;  %v1357_v14 = vadd.f32 %v4403_v7, %v1345_v12 }
 0x206   : > { %v1336_v16 = vpop.f32.mrb[9].mxu0  ;;  %v1348_v17 = vmul.f32 0.25, %v3538_v13  ;;  %v1364_v26 = vsel %vm1170_vm2, %v1358_v23, -inf }
 0x207   : > { %v1347_v18 = vmul.f32 0.25, %v1336_v16  ;;  %v1361_v19 = vsel %vm1170_vm2, %v1357_v14, -inf }
 0x208   : > { %1362 = vmax.xlane.f32.xlu0 %v1361_v19  ;;  %v1360_v27 = vadd.f32 %v4406_v15, %v1348_v17 }
 0x209   : > { %v1359_v24 = vadd.f32 %v4406_v15, %v1347_v18 }
 0x20a   : > { %v1370_v29 = vsel %vm1170_vm2, %v1360_v27, -inf }
 0x20b   : > { %v1367_v25 = vsel %vm1170_vm2, %v1359_v24, -inf }
 0x20c   : > { %1368 = vmax.xlane.f32.xlu1 %v1367_v25  ;;  %1365 = vmax.xlane.f32.xlu0 %v1364_v26 }
 0x210   : > { %1371 = vmax.xlane.f32.xlu1 %v1370_v29 }
 0x295   : > { %v1363_v30 = vpop.xlane.xlu0 %1362 }
 0x296   : > { %v1373_v32 = vsub.f32 %v1357_v14, %v1363_v30 }
 0x298   : > { %v1377_v34 = vmul.f32 1.442695, %v1373_v32 }
 0x299   : > { %v1369_v36 = vpop.xlane.xlu1 %1368  ;;  %v1366_v37 = vpop.xlane.xlu0 %1365 }
 0x29a   : > { %3936 = vpow2.f32 %v1377_v34  ;;  %v1375_v40 = vsub.f32 %v1359_v24, %v1369_v36  ;;  %v1374_v42 = vsub.f32 %v1358_v23, %v1366_v37 }
 0x29c   : > { %v1381_v43 = vmul.f32 1.442695, %v1375_v40  ;;  %v1379_v45 = vmul.f32 1.442695, %v1374_v42 }
 0x29d   : > { %v1372_v49 = vpop.xlane.xlu1 %1371 }
 0x29e   : > { %3938 = vpow2.f32 %v1381_v43  ;;  %v1376_v50 = vsub.f32 %v1360_v27, %v1372_v49 }
 0x29f   : > { %3940 = vpow2.f32 %v1379_v45 }
 0x2a0   : > { %v1383_v52 = vmul.f32 1.442695, %v1376_v50 }
 0x2a2   : > { %3942 = vpow2.f32 %v1383_v52 }
 0x2a4   : > { %v3937_v55 = vpop.eup %3936 }
 0x2a5   : > { %v1385_v56 = vsel %vm1170_vm2, %v3937_v55, 0.0 }
 0x2a6   : > { %1386 = vadd.xlane.f32.xlu0 %v1385_v56 }
 0x2a8   : > { %v3939_v58 = vpop.eup %3938 }
 0x2a9   : > { %v3941_v62 = vpop.eup %3940  ;;  %v1391_v63 = vsel %vm1170_vm2, %v3939_v58, 0.0 }
 0x2aa   : > { %1392 = vadd.xlane.f32.xlu0 %v1391_v63  ;;  %v1388_v3 = vsel %vm1170_vm2, %v3941_v62, 0.0 }
 0x2ab   : > { %1389 = vadd.xlane.f32.xlu1 %v1388_v3 }
 0x2ac   : > { %v3943_v4 = vpop.eup %3942 }
 0x2ad   : > { %v1394_v5 = vsel %vm1170_vm2, %v3943_v4, 0.0 }
 0x2af   : > { %1395 = vadd.xlane.f32.xlu1 %v1394_v5 }
 0x2c0   : > { %3910 = vrot.lane.b32.xlu1 %v3909_v44, %s4054_s6  ;;  %3905 = vrot.lane.b32.xlu0 %v3904_v35, %s4054_s6 }
 0x2c4   : > { %1567 = vrot.lane.b32.xlu1 %v4338_v38, %s4054_s6  ;;  %1658 = vrot.lane.b32.xlu0 %v4354_v46, %s4054_s6 }
 0x2c8   : > { %1569 = vrot.lane.b32.xlu1 %v4362_v47, %s4054_s6 }
 0x2cc   : > { %1660 = vrot.lane.b32.xlu1 %v4364_v48, %s4054_s6 }
 0x333   : > { %v1387_v6 = vpop.xlane.xlu0 %1386 }
 0x334   : > { %3944 = vrcp.f32 %v1387_v6 }
 0x337   : > { %v1393_v39 = vpop.xlane.xlu0 %1392 }
 0x338   : > { %v1390_v41 = vpop.xlane.xlu1 %1389  ;;  %3946 = vrcp.f32 %v1393_v39 }
 0x339   : > { %3948 = vrcp.f32 %v1390_v41 }
 0x33b   : > { %v3906_v28 = vpop.permute.xlu0 %3905 }
 0x33c   : > { %v1396_v31 = vpop.xlane.xlu1 %1395  ;;  %v3908_v35 = vunpack.i.h.bf16 %v3906_v28  ;;  %v3907_v44 = vunpack.i.l.bf16 %v3906_v28 }
 0x33d   : > { %3950 = vrcp.f32 %v1396_v31 }
 0x33e   : > { %v3945_v38 = vpop.eup %3944  ;;  %v3747_v8 = vpack.c.bf16 %v3908_v35, %v3907_v44 }
 0x33f   : > { %v1398_v46 = vmul.f32 %v3945_v38, %v3937_v55  ;;  %v1659_v24 = vpop.permute.xlu0 %1658 }
 0x340   : > { %v3911_v10 = vpop.permute.xlu1 %3910  ;;  %3749 = vmatprep.subr.msk.bf16.mxu0 %vm4330_vm3, %v3747_v8 }
 0x341   : > { %3543 = vmatprep.mubr.msk.f32.mxu1 %vm1170_vm2, %v1398_v46  ;;  %3752 = vmatpush3.bf16.xpose.msk.msra.mxu0 %vm4330_vm3, %v3747_v8  ;;  %v3913_v48 = vunpack.i.h.bf16 %v3911_v10  ;;  %v3912_v11 = vunpack.i.l.bf16 %v3911_v10 }
 0x342   : > { %v3947_v47 = vpop.eup %3946 }
 0x343   : > { %v3949_v12 = vpop.eup %3948  ;;  %v1402_v13 = vmul.f32 %v3947_v47, %v3939_v58  ;;  %v3753_v17 = vpack.c.bf16 %v3913_v48, %v3912_v11 }
 0x344   : > { %v1400_v14 = vmul.f32 %v3949_v12, %v3941_v62  ;;  %v1568_v16 = vpop.permute.xlu1 %1567 }
 0x345   : > { %3557 = vmatprep.mubr.msk.f32.mxu0 %vm1170_vm2, %v1568_v16 }
 0x346   : > { %3544 = vmatmul.mubr.msk.f32.vlgmr.msra.gmra.mrb[6].mxu1 %vm1170_vm2, %v1400_v14 }
 0x347   : > { %v3951_v18 = vpop.eup %3950  ;;  %3746 = vmatpush3.bf16.msra.mxu1 %v4391_v61  ;;  %3550 = vmatprep.mubr.msk.f32.mxu1 %vm1170_vm2, %v1402_v13 }
 0x348   : > { %v1404_v19 = vmul.f32 %v3951_v18, %v3943_v4  ;;  %3755 = vmatprep.subr.msk.bf16.mxu1 %vm4330_vm3, %v3753_v17  ;;  %v1570_v23 = vpop.permute.xlu1 %1569 }
 0x349   : > { %3558 = vmatmul.mubr.msk.f32.vlgmr.msra.gmra.mrb[10].mxu0 %vm1170_vm2, %v1570_v23 }
 0x34a   : > { %3551 = vmatmul.mubr.msk.f32.vlgmr.msra.gmra.mrb[8].mxu1 %vm1170_vm2, %v1404_v19 }
 0x34b   : > { %3564 = vmatprep.mubr.msk.f32.mxu1 %vm1170_vm2, %v1659_v24 }
 0x34c   : > { %v1661_v25 = vpop.permute.xlu1 %1660 }
 0x350   : > { %3758 = vmatpush3.bf16.xpose.msk.msra.mxu1 %vm4330_vm3, %v3753_v17 }
 0x357   : > { %3565 = vmatmul.mubr.msk.f32.vlgmr.msra.gmra.mrb[10].mxu1 %vm1170_vm2, %v1661_v25 }
 0x419   : > { %v4452_v61 = vpop.f32.mrb[6].mxu1 }
 0x41a   : > { %v4454_v26 = vpop.f32.mrb[7].mxu1 }
 0x41c   : > { %v3559_v27 = vpop.f32.mrb[10].mxu0 }
 0x41d   : > { %v1750_v29 = vmul.f32 0.25, %v3559_v27  ;;  %v4456_v30 = vpop.f32.mrb[8].mxu1  ;;  %v1649_v32 = vpop.f32.mrb[11].mxu0 }
 0x41e   : > { %v1749_v34 = vmul.f32 0.25, %v1649_v32  ;;  %v4458_v36 = vpop.f32.mrb[9].mxu1 }
 0x41f   : > { %v1754_v37 = vadd.f32 %v1750_v29, %v4403_v7 }
 0x420   : > { %v1753_v33 = vadd.f32 %v1749_v34, %v4403_v7  ;;  %v1999_v34 = vld [vmem:[%s4809_s27] sm:$0xff] }
 0x421   : > { %v1760_v40 = vsel %vm1170_vm2, %v1754_v37, -inf }
 0x422   : > { %1761 = vmax.xlane.f32.xlu1 %v1760_v40  ;;  %v1757_v42 = vsel %vm1170_vm2, %v1753_v33, -inf  ;;  %v2001_v40 = vld [vmem:[%s4809_s27 + $0x10] sm:$0xff] }
 0x423   : > { %1758 = vmax.xlane.f32.xlu0 %v1757_v42  ;;  %v2002_v42 = vld [vmem:[%s4809_s27 + $0x18] sm:$0xff] }
 0x42a   : > { %v3566_v43 = vpop.f32.mrb[10].mxu1 }
 0x42b   : > { %v1740_v45 = vpop.f32.mrb[11].mxu1  ;;  %v1752_v49 = vmul.f32 0.25, %v3566_v43  ;;  %v3771_v43 = vpack.c.bf16 %v2002_v42, %v2001_v40  ;;  %v3300_v40 = vld [vmem:[%s4238_s30 + $0x30] sm:$0xff]  ;;  %v3301_v42 = vld [vmem:[%s4238_s30 + $0x38] sm:$0xff] }
 0x42c   : > { %v1751_v50 = vmul.f32 0.25, %v1740_v45 }
 0x42d   : > { %v1756_v56 = vadd.f32 %v1752_v49, %v4406_v15 }
 0x42e   : > { %v1755_v52 = vadd.f32 %v1751_v50, %v4406_v15 }
 0x42f   : > { %v1766_v58 = vsel %vm1170_vm2, %v1756_v56, -inf }
 0x430   : > { %v1763_v55 = vsel %vm1170_vm2, %v1755_v52, -inf }
 0x431   : > { %1764 = vmax.xlane.f32.xlu0 %v1763_v55 }
 0x435   : > { %1767 = vmax.xlane.f32.xlu0 %v1766_v58 }
 0x4af   : > { %v1762_v7 = vpop.xlane.xlu1 %1761 }
 0x4b0   : > { %v1770_v62 = vsub.f32 %v1754_v37, %v1762_v7  ;;  %v1759_v63 = vpop.xlane.xlu0 %1758  ;;  %v2000_v37 = vld [vmem:[%s4809_s27 + $0x8] sm:$0xff] }
 0x4b1   : > { %v1769_v3 = vsub.f32 %v1753_v33, %v1759_v63  ;;  %v3767_v33 = vpack.c.bf16 %v2000_v37, %v1999_v34 }
 0x4b2   : > { %v1775_v4 = vmul.f32 1.442695, %v1770_v62 }
 0x4b3   : > { %v1773_v5 = vmul.f32 1.442695, %v1769_v3 }
 0x4b4   : > { %3952 = vpow2.f32 %v1775_v4 }
 0x4b5   : > { %3954 = vpow2.f32 %v1773_v5 }
 0x4be   : > { %v3953_v6 = vpop.eup %3952  ;;  %v1765_v39 = vpop.xlane.xlu0 %1764 }
 0x4bf   : > { %v3955_v41 = vpop.eup %3954  ;;  %v1771_v28 = vsub.f32 %v1755_v52, %v1765_v39  ;;  %v1784_v31 = vsel %vm1170_vm2, %v3953_v6, 0.0 }
 0x4c0   : > { %1785 = vadd.xlane.f32.xlu1 %v1784_v31  ;;  %v1781_v15 = vsel %vm1170_vm2, %v3955_v41, 0.0 }
 0x4c1   : > { %v1777_v35 = vmul.f32 1.442695, %v1771_v28  ;;  %1782 = vadd.xlane.f32.xlu0 %v1781_v15 }
 0x4c2   : > { %v1768_v44 = vpop.xlane.xlu0 %1767 }
 0x4c3   : > { %3956 = vpow2.f32 %v1777_v35  ;;  %v1772_v38 = vsub.f32 %v1756_v56, %v1768_v44 }
 0x4c5   : > { %v1779_v8 = vmul.f32 1.442695, %v1772_v38 }
 0x4c7   : > { %3958 = vpow2.f32 %v1779_v8 }
 0x4cd   : > { %v3957_v46 = vpop.eup %3956 }
 0x4ce   : > { %v1787_v10 = vsel %vm1170_vm2, %v3957_v46, 0.0 }
 0x4cf   : > { %1788 = vadd.xlane.f32.xlu0 %v1787_v10 }
 0x4d1   : > { %v3959_v47 = vpop.eup %3958 }
 0x4d2   : > { %v1790_v48 = vsel %vm1170_vm2, %v3959_v47, 0.0 }
 0x4d3   : > { %1791 = vadd.xlane.f32.xlu1 %v1790_v48 }
 0x4e4   : > { %3920 = vrot.lane.b32.xlu1 %v3919_v60, %s4054_s6 }
 0x4e5   : > { %3915 = vrot.lane.b32.xlu0 %v3914_v54, %s4054_s6 }
 0x54d   : > { %v1786_v12 = vpop.xlane.xlu1 %1785 }
 0x54e   : > { %v1783_v11 = vpop.xlane.xlu0 %1782 }
 0x54f   : > { %3960 = vrcp.f32 %v1783_v11 }
 0x550   : > { %3962 = vrcp.f32 %v1786_v12 }
 0x559   : > { %v3961_v13 = vpop.eup %3960 }
 0x55a   : > { %v1794_v14 = vmul.f32 %v3961_v13, %v3955_v41  ;;  %v3963_v19 = vpop.eup %3962 }
 0x55b   : > { %v1796_v24 = vmul.f32 %v3963_v19, %v3953_v6 }
 0x55c   : > { %v1789_v16 = vpop.xlane.xlu0 %1788  ;;  %3571 = vmatprep.mubr.msk.f32.mxu0 %vm1170_vm2, %v1794_v14 }
 0x55d   : > { %3964 = vrcp.f32 %v1789_v16 }
 0x560   : > { %v1792_v17 = vpop.xlane.xlu1 %1791  ;;  %v3916_v18 = vpop.permute.xlu0 %3915 }
 0x561   : > { %3966 = vrcp.f32 %v1792_v17  ;;  %v3918_v57 = vunpack.i.h.bf16 %v3916_v18  ;;  %v3917_v59 = vunpack.i.l.bf16 %v3916_v18 }
 0x563   : > { %v3759_v60 = vpack.c.bf16 %v3918_v57, %v3917_v59 }
 0x564   : > { %v3921_v23 = vpop.permute.xlu1 %3920 }
 0x565   : > { %v3923_v51 = vunpack.i.h.bf16 %v3921_v23  ;;  %v3922_v53 = vunpack.i.l.bf16 %v3921_v23  ;;  %3760 = vmatprep.subr.bf16.mxu0 %v3759_v60 }
 0x566   : > { %3762 = vmatpush3.bf16.msra.mxu0 %v3759_v60 }
 0x567   : > { %v3965_v54 = vpop.eup %3964  ;;  %v3763_v25 = vpack.c.bf16 %v3923_v51, %v3922_v53  ;;  %3768 = vmatprep.subr.bf16.mxu0 %v3767_v33 }
 0x568   : > { %v1798_v27 = vmul.f32 %v3965_v54, %v3957_v46 }
 0x569   : > { %3572 = vmatmul.mubr.msk.f32.vlgmr.msra.gmra.mrb[12].mxu0 %vm1170_vm2, %v1796_v24  ;;  %3764 = vmatprep.subr.bf16.mxu1 %v3763_v25  ;;  %v842_v24 = vadd.s32 8, %v4396_v1  ;;  %v3299_v1 = vld [vmem:[%s4238_s30 + $0x28] sm:$0xff] }
 0x56a   : > { %3766 = vmatpush3.bf16.msra.mxu1 %v3763_v25  ;;  %3578 = vmatprep.mubr.msk.f32.mxu1 %vm1170_vm2, %v1798_v27  ;;  %v4057_v25 = vmov 0.0  }
 0x56b   : > { %v3967_v29 = vpop.eup %3966  ;;  %3770 = vmatpush3.bf16.msra.mxu0 %v3767_v33  ;;  %vm858_vm7 = vcmp.lt.s32.totalorder %v842_v24, %v4399_v2  ;;  %vm845_vm9 = vcmp.lt.s32.totalorder %v842_v24, %v4394_v0  ;;  %v3250_v27 = vsel %vm857_vm6, 1.0, %v4057_v25  ;;  %v3298_v2 = vld [vmem:[%s4238_s30 + $0x20] sm:$0xff]  ;;  %2211 = vst.msk [vmem:[#allocation3] sm:$0x1] %vm2210_vm10, %v4057_v25  ;;  %2212 = vst.msk [vmem:[#allocation3 + $0x18] sm:$0x1] %vm2210_vm10, %v4057_v25 }
 0x56c   : > { %v1800_v32 = vmul.f32 %v3967_v29, %v3959_v47  ;;  %3772 = vmatprep.subr.bf16.mxu0 %v3771_v43  ;;  %v3251_v29 = vsel %vm858_vm7, 1.0, %v4057_v25  ;;  %v3248_v34 = vsel %vm845_vm9, 1.0, %v4057_v25  ;;  %v3775_v0 = vpack.c.bf16 %v3299_v1, %v3298_v2  ;;  %2213 = vst.msk [vmem:[#allocation3 + $0x11] sm:$0x1] %vm2210_vm10, %v4057_v25  ;;  %2214 = vst.msk [vmem:[#allocation3 + $0x29] sm:$0x1] %vm2210_vm10, %v4057_v25 }
 0x56d   : > { %v3931_v37 = vpack.i.bf16 %v3251_v29, %v3250_v27  ;;  %v3310_v27 = vld [vmem:[%s4238_s30 + $0x40] sm:$0xff]  ;;  %v3311_v29 = vld [vmem:[%s4238_s30 + $0x48] sm:$0xff]  ;;  %v3313_v2 = vld [vmem:[%s4238_s30 + $0x58] sm:$0xff]  ;;  %2556 = vst.msk [vmem:[#allocation4] sm:$0x1] %vm2555_vm11, %v4057_v25 }
 0x56e   : > { %3579 = vmatmul.mubr.msk.f32.vlgmr.msra.gmra.mrb[12].mxu1 %vm1170_vm2, %v1800_v32  ;;  %v3247_v32 = vsel %vm844_vm8, 1.0, %v4057_v25  ;;  %3776 = vmatprep.subr.bf16.mxu1 %v3775_v0  ;;  %2557 = vst.msk [vmem:[#allocation4 + $0x18] sm:$0x1] %vm2555_vm11, %v4057_v25  ;;  %2558 = vst.msk [vmem:[#allocation4 + $0x11] sm:$0x1] %vm2555_vm11, %v4057_v25 }
 0x56f   : > { %3774 = vmatpush3.bf16.msra.mxu0 %v3771_v43  ;;  %v3925_v33 = vpack.i.bf16 %v3248_v34, %v3247_v32  ;;  %3778 = vmatpush3.bf16.msra.mxu1 %v3775_v0  ;;  %v3779_v43 = vpack.c.bf16 %v3301_v42, %v3300_v40  ;;  %v3791_v34 = vpack.c.bf16 %v3311_v29, %v3310_v27  ;;  %v3319_v42 = vld [vmem:[%s4247_s19 + $0x40] sm:$0xff]  ;;  %v3338_v27 = vld [vmem:[%s4247_s19 + $0x98] sm:$0xff] }
 0x570   : > { %2559 = vst.msk [vmem:[#allocation4 + $0x29] sm:$0x1] %vm2555_vm11, %v4057_v25  ;;  %v3318_v25 = vld [vmem:[%s4813_s25] ss:$0 sm:$0xff] }
 0x571   : > { %3780 = vmatprep.subr.bf16.mxu1 %v3779_v43 }
 0x573   : > { %3782 = vmatpush3.bf16.msra.mxu1 %v3779_v43  ;;  %v3320_v43 = vld [vmem:[%s4247_s19 + $0x48] sm:$0xff] }
 0x63c   : > { %v3573_v45 = vpop.f32.mrb[12].mxu0 }
 0x63d   : > { %v1881_v49 = vpop.f32.mrb[13].mxu0 }
 0x63e   : > { %1983 = vrot.lane.b32.xlu1 %v1881_v49, %s4055_s12  ;;  %v2224_v49 = vld [vmem:[%s4238_s30 + $0x8] sm:$0xff] }
 0x641   : > { %v3580_v50 = vpop.f32.mrb[12].mxu1 }
 0x642   : > { %v1970_v52 = vpop.f32.mrb[13].mxu1  ;;  %1985 = vrot.lane.b32.xlu1 %v3573_v45, %s4055_s12  ;;  %v2223_v45 = vld [vmem:[%s4238_s30] sm:$0xff] }
 0x643   : > { %1987 = vrot.lane.b32.xlu0 %v1970_v52, %s4055_s12  ;;  %v2569_v52 = vld [vmem:[%s4247_s19] sm:$0xff] }
 0x646   : > { %1989 = vrot.lane.b32.xlu1 %v3580_v50, %s4055_s12  ;;  %v4554_v50 = vpack.c.bf16 %v2224_v49, %v2223_v45  ;;  %v3799_v49 = vpack.c.bf16 %v3320_v43, %v3319_v42 }
 0x648   : > { %3784 = vmatprep.subr.bf16.mxu1 %v4554_v50 }
 0x6b0   : > { %v1984_v55 = vpop.permute.xlu1 %1983 }
 0x6b1   : > { %v1995_v56 = vsel %vm1170_vm2, %v4454_v26, %v1984_v55  ;;  %v3291_v26 = vld [vmem:[%s4810_s20] ss:$0 sm:$0xff]  ;;  %v2570_v55 = vld [vmem:[%s4247_s19 + $0x8] sm:$0xff] }
 0x6b2   : > { %3589 = vmatprep.mubr.msk.f32.mxu0 %vm880_vm1, %v1995_v56  ;;  %v3815_v56 = vpack.c.bf16 %v2570_v55, %v2569_v52 }
 0x6b4   : > { %v1986_v58 = vpop.permute.xlu1 %1985  ;;  %3816 = vmatprep.subr.bf16.mxu0 %v3815_v56 }
 0x6b5   : > { %v1996_v7 = vsel %vm1170_vm2, %v4452_v61, %v1986_v58  ;;  %v1988_v62 = vpop.permute.xlu0 %1987 }
 0x6b6   : > { %v1997_v63 = vsel %vm1170_vm2, %v4458_v36, %v1988_v62  ;;  %3590 = vmatmul.mubr.msk.f32.vlgmr.msra.gmra.mrb[14].mxu0 %vm880_vm1, %v1996_v7 }
 0x6b7   : > { %3592 = vmatprep.mubr.msk.f32.mxu0 %vm880_vm1, %v1997_v63  ;;  %3818 = vmatpush3.bf16.msra.mxu0 %v3815_v56 }
 0x6b8   : > { %v1990_v3 = vpop.permute.xlu1 %1989 }
 0x6b9   : > { %v1998_v4 = vsel %vm1170_vm2, %v4456_v30, %v1990_v3 }
 0x6ba   : > { %3593 = vmatmul.mubr.msk.f32.gmra.mrb[16].mxu0 %vm880_vm1, %v1998_v4 }
 0x789   : > { %v3591_v61 = vpop.f32.mrb[14].mxu0 }
 0x78a   : > { %v2094_v5 = vadd.f32 %v3591_v61, %v3291_v26  ;;  %v2088_v6 = vpop.f32.mrb[15].mxu0 }
 0x78b   : > { %v2089_v39 = vadd.f32 %v3291_v26, %v2088_v6 }
 0x78c   : > { %v2108_v36 = vadd.f32 %v2094_v5, %v4286_v20 }
 0x78d   : > { %v3594_v41 = vpop.f32.mrb[16].mxu0  ;;  %v2107_v28 = vadd.f32 %v2089_v39, %v4274_v9  ;;  %v4056_v9 = vmov 0  }
 0x78e   : > { %v2098_v31 = vpop.f32.mrb[17].mxu0  ;;  %v2116_v15 = vsel %vm880_vm1, %v2108_v36, 0.0  ;;  %v2104_v30 = vadd.f32 %v3594_v41, %v3291_v26  ;;  %3924 = vset.pattern.permute.xlu0 %v4056_v9  ;;  %3930 = vset.pattern.permute.xlu1 %v4056_v9 }
 0x78f   : > { %v2099_v35 = vadd.f32 %v3291_v26, %v2098_v31  ;;  %2117 = vadd.xlane.f32.xlu1 %v2116_v15  ;;  %v2113_v44 = vsel %vm880_vm1, %v2107_v28, 0.0 }
 0x790   : > { %2114 = vadd.xlane.f32.xlu0 %v2113_v44  ;;  %v2110_v46 = vadd.f32 %v2104_v30, %v4294_v22 }
 0x791   : > { %v2109_v38 = vadd.f32 %v2099_v35, %v4288_v21  ;;  %v3297_v35 = vld [vmem:[%s4812_s4] ss:$0 sm:$0xff] }
 0x792   : > { %v2122_v20 = vsel %vm880_vm1, %v2110_v46, 0.0 }
 0x793   : > { %v2119_v8 = vsel %vm880_vm1, %v2109_v38, 0.0 }
 0x794   : > { %2120 = vadd.xlane.f32.xlu0 %v2119_v8 }
 0x798   : > { %2123 = vadd.xlane.f32.xlu0 %v2122_v20 }
 0x81c   : > { %v2118_v10 = vpop.xlane.xlu1 %2117 }
 0x81d   : > { %v2127_v47 = vmul.f32 0.03125, %v2118_v10  ;;  %v2115_v48 = vpop.xlane.xlu0 %2114 }
 0x81e   : > { %v2126_v11 = vmul.f32 0.03125, %v2115_v48 }
 0x81f   : > { %v4513_v12 = vsub.f32 %v2108_v36, %v2127_v47 }
 0x820   : > { %v4515_v13 = vsub.f32 %v2107_v28, %v2126_v11  ;;  %v3296_v28 = vld [vmem:[%s4811_s2] ss:$0 sm:$0xff] }
 0x821   : > { %v2121_v21 = vpop.xlane.xlu0 %2120  ;;  %v2135_v14 = vmul.f32 %v4513_v12, %v4513_v12 }
 0x822   : > { %v2128_v22 = vmul.f32 0.03125, %v2121_v21  ;;  %v2134_v16 = vmul.f32 %v4515_v13, %v4515_v13 }
 0x823   : > { %v2141_v17 = vsel %vm880_vm1, %v2135_v14, 0.0 }
 0x824   : > { %v4522_v18 = vsub.f32 %v2109_v38, %v2128_v22  ;;  %2142 = vadd.xlane.f32.xlu1 %v2141_v17  ;;  %v2138_v57 = vsel %vm880_vm1, %v2134_v16, 0.0 }
 0x825   : > { %2139 = vadd.xlane.f32.xlu0 %v2138_v57  ;;  %v2124_v59 = vpop.xlane.xlu0 %2123 }
 0x826   : > { %v2129_v60 = vmul.f32 0.03125, %v2124_v59  ;;  %v2136_v19 = vmul.f32 %v4522_v18, %v4522_v18 }
 0x828   : > { %v4527_v23 = vsub.f32 %v2110_v46, %v2129_v60  ;;  %v2144_v51 = vsel %vm880_vm1, %v2136_v19, 0.0  ;;  %v2225_v19 = vld [vmem:[%s4238_s30 + $0x10] sm:$0xff] }
 0x829   : > { %2145 = vadd.xlane.f32.xlu0 %v2144_v51  ;;  %v2226_v51 = vld [vmem:[%s4238_s30 + $0x18] sm:$0xff] }
 0x82a   : > { %v2137_v53 = vmul.f32 %v4527_v23, %v4527_v23 }
 0x82c   : > { %v2147_v54 = vsel %vm880_vm1, %v2137_v53, 0.0 }
 0x82d   : > { %2148 = vadd.xlane.f32.xlu1 %v2147_v54  ;;  %v3787_v54 = vpack.c.bf16 %v2226_v51, %v2225_v19 }
 0x83e   : > { %3932 = vperm.xlu1 %3930, %v3931_v37  }
 0x83f   : > { %3926 = vperm.xlu0 %3924, %v3925_v33   ;;  %v3312_v33 = vld [vmem:[%s4238_s30 + $0x50] sm:$0xff] }
 0x840   : > { %v3795_v0 = vpack.c.bf16 %v3313_v2, %v3312_v33  ;;  %v3339_v2 = vld [vmem:[%s4247_s19 + $0xa0] sm:$0xff] }
 0x8b1   : > { %v2143_v58 = vpop.xlane.xlu1 %2142 }
 0x8b2   : > { %v2151_v7 = vmul.f32 0.03125, %v2143_v58  ;;  %v2140_v62 = vpop.xlane.xlu0 %2139 }
 0x8b3   : > { %v2150_v63 = vmul.f32 0.03125, %v2140_v62  ;;  %v2572_v62 = vld [vmem:[%s4247_s19 + $0x18] sm:$0xff] }
 0x8b4   : > { %v2155_v3 = vadd.f32 1e-05, %v2151_v7  ;;  %v2571_v7 = vld [vmem:[%s4247_s19 + $0x10] sm:$0xff] }
 0x8b5   : > { %v2154_v4 = vadd.f32 1e-05, %v2150_v63  ;;  %v3819_v63 = vpack.c.bf16 %v2572_v62, %v2571_v7 }
 0x8b6   : > { %3968 = vrsqrt.f32 %v2155_v3  ;;  %v2146_v26 = vpop.xlane.xlu0 %2145  ;;  %v3321_v3 = vld [vmem:[%s4247_s19 + $0x50] sm:$0xff] }
 0x8b7   : > { %3970 = vrsqrt.f32 %v2154_v4  ;;  %v2152_v61 = vmul.f32 0.03125, %v2146_v26  ;;  %v3322_v4 = vld [vmem:[%s4247_s19 + $0x58] sm:$0xff]  ;;  %3820 = vmatprep.subr.bf16.mxu0 %v3819_v63 }
 0x8b8   : > { %v3803_v26 = vpack.c.bf16 %v3322_v4, %v3321_v3  ;;  %3822 = vmatpush3.bf16.msra.mxu0 %v3819_v63 }
 0x8b9   : > { %v2156_v5 = vadd.f32 1e-05, %v2152_v61  ;;  %v2573_v61 = vld [vmem:[%s4247_s19 + $0x20] sm:$0xff] }
 0x8ba   : > { %v2149_v6 = vpop.xlane.xlu1 %2148 }
 0x8bb   : > { %3972 = vrsqrt.f32 %v2156_v5  ;;  %v2153_v39 = vmul.f32 0.03125, %v2149_v6  ;;  %v2574_v5 = vld [vmem:[%s4247_s19 + $0x28] sm:$0xff] }
 0x8bc   : > { %v3823_v6 = vpack.c.bf16 %v2574_v5, %v2573_v61  ;;  %v3347_v61 = vld [vmem:[%s817_s1] ss:$0 sm:$0xff] }
 0x8bd   : > { %v2157_v36 = vadd.f32 1e-05, %v2153_v39  ;;  %v3323_v39 = vld [vmem:[%s4247_s19 + $0x60] sm:$0xff] }
 0x8be   : > { %v4564_v31 = vpop.permute.xlu0 %3926  ;;  %v4575_v47 = vpop.permute.xlu1 %3932  ;;  %3824 = vmatprep.subr.bf16.mxu0 %v3823_v6 }
 0x8bf   : > { %3974 = vrsqrt.f32 %v2157_v36  ;;  %v3929_v8 = vunpack.i.h.bf16 %v4564_v31  ;;  %v3928_v20 = vunpack.i.l.bf16 %v4564_v31  ;;  %v3934_v14 = vunpack.i.l.bf16 %v4575_v47  ;;  %v3324_v36 = vld [vmem:[%s4247_s19 + $0x68] sm:$0xff]  ;;  %3826 = vmatpush3.bf16.msra.mxu0 %v3823_v6 }
 0x8c0   : > { %v3969_v41 = vpop.eup %3968  ;;  %v3935_v57 = vunpack.i.h.bf16 %v4575_v47 }
 0x8c1   : > { %v3971_v15 = vpop.eup %3970  ;;  %v2163_v30 = vmul.f32 %v3969_v41, %v4513_v12  ;;  %v3807_v41 = vpack.c.bf16 %v3324_v36, %v3323_v39 }
 0x8c2   : > { %v2162_v44 = vmul.f32 %v3971_v15, %v4515_v13  ;;  %v2576_v15 = vld [vmem:[%s4247_s19 + $0x38] sm:$0xff] }
 0x8c3   : > { %v2173_v38 = vmul.f32 %v3296_v28, %v2163_v30 }
 0x8c4   : > { %v2172_v46 = vmul.f32 %v3296_v28, %v2162_v44  ;;  %v3326_v44 = vld [vmem:[%s4247_s19 + $0x78] sm:$0xff] }
 0x8c5   : > { %v3973_v9 = vpop.eup %3972  ;;  %v2183_v10 = vadd.f32 %v3297_v35, %v2173_v38 }
 0x8c6   : > { %v2182_v48 = vadd.f32 %v3297_v35, %v2172_v46  ;;  %v2164_v11 = vmul.f32 %v3973_v9, %v4522_v18  ;;  %v3335_v46 = vld [vmem:[%s4247_s19 + $0x80] sm:$0xff]  ;;  %v3336_v9 = vld [vmem:[%s4247_s19 + $0x88] sm:$0xff] }
 0x8c7   : > { %v4580_v12 = vmul.f32 %v3929_v8, %v2183_v10  ;;  %v3831_v10 = vpack.c.bf16 %v3336_v9, %v3335_v46 }
 0x8c8   : > { %v4584_v13 = vmul.f32 %v3928_v20, %v2182_v48  ;;  %v2174_v21 = vmul.f32 %v3296_v28, %v2164_v11 }
 0x8c9   : > { %v3975_v22 = vpop.eup %3974  ;;  %2216 = vst.msk [vmem:[#allocation3 + $0x9] sm:$0xff] %vm880_vm1, %v4580_v12 }
 0x8ca   : > { %2215 = vst.msk [vmem:[#allocation3 + $0x1] sm:$0xff] %vm880_vm1, %v4584_v13  ;;  %v2165_v16 = vmul.f32 %v3975_v22, %v4527_v23  ;;  %v2184_v17 = vadd.f32 %v3297_v35, %v2174_v21 }
 0x8cc   : > { %v2175_v18 = vmul.f32 %v3296_v28, %v2165_v16  ;;  %v4595_v59 = vmul.f32 %v3934_v14, %v2184_v17  ;;  %v2575_v28 = vld [vmem:[%s4247_s19 + $0x30] sm:$0xff] }
 0x8cd   : > { %v3827_v30 = vpack.c.bf16 %v2576_v15, %v2575_v28 }
 0x8ce   : > { %v2185_v60 = vadd.f32 %v3297_v35, %v2175_v18  ;;  %2217 = vst.msk [vmem:[#allocation3 + $0x19] sm:$0xff] %vm880_vm1, %v4595_v59  ;;  %v3325_v35 = vld [vmem:[%s4247_s19 + $0x70] sm:$0xff] }
 0x8cf   : > { %v3811_v38 = vpack.c.bf16 %v3326_v44, %v3325_v35  ;;  %3828 = vmatprep.subr.bf16.mxu0 %v3827_v30 }
 0x8d0   : > { %v4603_v53 = vmul.f32 %v3935_v57, %v2185_v60  ;;  %v2228_v24 = vld [vmem:[#allocation3 + $0x9] sm:$0xff]  ;;  %3830 = vmatpush3.bf16.msra.mxu0 %v3827_v30 }
 0x8d1   : > { %v2227_v23 = vld [vmem:[#allocation3 + $0x1] sm:$0xff]  ;;  %v2431_v55 = vld [vmem:[#allocation3 + $0xa] sm:$0xff]  ;;  %3832 = vmatprep.subr.bf16.mxu0 %v3831_v10 }
 0x8d2   : > { %2218 = vst.msk [vmem:[#allocation3 + $0x21] sm:$0xff] %vm880_vm1, %v4603_v53  ;;  %3603 = vmatprep.mubr.msk.f32.mxu1 %vm880_vm1, %v2227_v23  ;;  %v2219_v1 = vld [vmem:[#allocation3] sm:$0xff]  ;;  %v2220_v40 = vld [vmem:[#allocation3 + $0x8] sm:$0xff] }
 0x8d3   : > { %3604 = vmatmul.mubr.msk.f32.vlgmr.msra.gmra.mrb[14].mxu1 %vm880_vm1, %v2228_v24  ;;  %v2430_v52 = vld [vmem:[#allocation3 + $0x2] sm:$0xff]  ;;  %v3337_v24 = vld [vmem:[%s4247_s19 + $0x90] sm:$0xff] }
 0x8d4   : > { %3786 = vmatpush3.bf16.msra.mxu1 %v4554_v50 }
 0x8d5   : > { %v2229_v32 = vld [vmem:[#allocation3 + $0x19] sm:$0xff]  ;;  %3788 = vmatprep.subr.bf16.mxu1 %v3787_v54 }
 0x8d6   : > { %3606 = vmatprep.mubr.msk.f32.mxu1 %vm880_vm1, %v2229_v32  ;;  %v2221_v45 = vld [vmem:[#allocation3 + $0x18] sm:$0xff] }
 0x8d8   : > { %3790 = vmatpush3.bf16.msra.mxu1 %v3787_v54 }
 0x8d9   : > { %v2230_v37 = vld [vmem:[#allocation3 + $0x21] sm:$0xff]  ;;  %3792 = vmatprep.subr.bf16.mxu1 %v3791_v34 }
 0x8da   : > { %3607 = vmatmul.mubr.msk.f32.gmra.mrb[16].mxu1 %vm880_vm1, %v2230_v37  ;;  %v2222_v50 = vld [vmem:[#allocation3 + $0x20] sm:$0xff]  ;;  %v3835_v37 = vpack.c.bf16 %v3338_v27, %v3337_v24 }
 0x8db   : > { %3617 = vmatprep.mubr.msk.f32.mxu1 %vm880_vm1, %v2219_v1  ;;  %v2432_v56 = vld [vmem:[#allocation3 + $0x1a] sm:$0xff]  ;;  %v2433_v58 = vld [vmem:[#allocation3 + $0x22] sm:$0xff] }
 0x8dc   : > { %v3340_v1 = vld [vmem:[%s4247_s19 + $0xa8] sm:$0xff] }
 0x8dd   : > { %v3839_v43 = vpack.c.bf16 %v3340_v1, %v3339_v2 }
 0x8de   : > { %3618 = vmatmul.mubr.msk.f32.vlgmr.msra.gmra.mrb[14].mxu1 %vm880_vm1, %v2220_v40 }
 0x8df   : > { %3620 = vmatprep.mubr.msk.f32.mxu1 %vm880_vm1, %v2221_v45  ;;  %3794 = vmatpush3.bf16.msra.mxu1 %v3791_v34 }
 0x8e0   : > { %3796 = vmatprep.subr.bf16.mxu1 %v3795_v0 }
 0x8e2   : > { %3621 = vmatmul.mubr.msk.f32.gmra.mrb[16].mxu1 %vm880_vm1, %v2222_v50  ;;  %v3342_v50 = vld [vmem:[%s4247_s19 + $0xb8] sm:$0xff] }
 0x8e3   : > { %3798 = vmatpush3.bf16.msra.mxu1 %v3795_v0  ;;  %3631 = vmatprep.mubr.msk.f32.mxu1 %vm880_vm1, %v2430_v52 }
 0x8e4   : > { %3800 = vmatprep.subr.bf16.mxu1 %v3799_v49 }
 0x8e6   : > { %3632 = vmatmul.mubr.msk.f32.vlgmr.msra.gmra.mrb[14].mxu1 %vm880_vm1, %v2431_v55 }
 0x8e7   : > { %3634 = vmatprep.mubr.msk.f32.mxu1 %vm880_vm1, %v2432_v56  ;;  %3802 = vmatpush3.bf16.msra.mxu1 %v3799_v49  ;;  %v3341_v49 = vld [vmem:[%s4247_s19 + $0xb0] sm:$0xff] }
 0x8e8   : > { %3804 = vmatprep.subr.bf16.mxu1 %v3803_v26  ;;  %v3843_v55 = vpack.c.bf16 %v3342_v50, %v3341_v49 }
 0x8ea   : > { %3635 = vmatmul.mubr.msk.f32.gmra.mrb[16].mxu1 %vm880_vm1, %v2433_v58 }
 0x8eb   : > { %3806 = vmatpush3.bf16.msra.mxu1 %v3803_v26 }
 0x8ec   : > { %3808 = vmatprep.subr.bf16.mxu1 %v3807_v41 }
 0x8ef   : > { %3810 = vmatpush3.bf16.msra.mxu1 %v3807_v41 }
 0x8f0   : > { %3812 = vmatprep.subr.bf16.mxu1 %v3811_v38 }
 0x8f3   : > { %3814 = vmatpush3.bf16.msra.mxu1 %v3811_v38 }
 0x9b9   : > { %v3633_v48 = vpop.f32.mrb[14].mxu1 }
 0x9ba   : > { %v2548_v11 = vadd.f32 %v3633_v48, %v3318_v25  ;;  %v2517_v21 = vpop.f32.mrb[15].mxu1 }
 0x9bb   : > { %v2547_v22 = vadd.f32 %v3318_v25, %v2517_v21 }
 0x9bc   : > { %v2552_v16 = vmax.f32 %v2548_v11, 0.0 }
 0x9bd   : > { %v2551_v17 = vmax.f32 %v2547_v22, 0.0  ;;  %v3636_v18 = vpop.f32.mrb[16].mxu1 }
 0x9be   : > { %2562 = vst.msk [vmem:[#allocation4 + $0x9] sm:$0xff] %vm2560_vm12, %v2552_v16  ;;  %v2550_v60 = vadd.f32 %v3636_v18, %v3318_v25  ;;  %v2527_v19 = vpop.f32.mrb[17].mxu1 }
 0x9bf   : > { %2561 = vst.msk [vmem:[#allocation4 + $0x1] sm:$0xff] %vm2560_vm12, %v2551_v17  ;;  %v2549_v51 = vadd.f32 %v3318_v25, %v2527_v19 }
 0x9c0   : > { %v2554_v23 = vmax.f32 %v2550_v60, 0.0 }
 0x9c1   : > { %v2553_v54 = vmax.f32 %v2549_v51, 0.0 }
 0x9c2   : > { %2564 = vst.msk [vmem:[#allocation4 + $0x21] sm:$0xff] %vm2560_vm12, %v2554_v23 }
 0x9c3   : > { %2563 = vst.msk [vmem:[#allocation4 + $0x19] sm:$0xff] %vm2560_vm12, %v2553_v54 }
 0x9c5   : > { %v2578_v33 = vld [vmem:[#allocation4 + $0x9] sm:$0xff] }
 0x9c6   : > { %v2577_v29 = vld [vmem:[#allocation4 + $0x1] sm:$0xff]  ;;  %v2785_v56 = vld [vmem:[#allocation4 + $0xa] sm:$0xff] }
 0x9c7   : > { %v2565_v32 = vld [vmem:[#allocation4] sm:$0xff]  ;;  %v2566_v34 = vld [vmem:[#allocation4 + $0x8] sm:$0xff]  ;;  %3653 = vmatprep.mubr.msk.f32.mxu1 %vm2560_vm12, %v2577_v29 }
 0x9c8   : > { %3675 = vmatprep.mubr.msk.f32.mxu0 %vm2560_vm12, %v2565_v32  ;;  %3654 = vmatmul.mubr.msk.f32.vlgmr.msra.gmra.mrb[18].mxu1 %vm2560_vm12, %v2578_v33  ;;  %v2784_v52 = vld [vmem:[#allocation4 + $0x2] sm:$0xff] }
 0x9c9   : > { %3676 = vmatmul.mubr.msk.f32.vlgmr.msra.gmra.mrb[18].mxu0 %vm2560_vm12, %v2566_v34  ;;  %v2580_v45 = vld [vmem:[#allocation4 + $0x21] sm:$0xff] }
 0x9ca   : > { %3834 = vmatpush3.bf16.msra.mxu0 %v3831_v10  ;;  %v2579_v0 = vld [vmem:[#allocation4 + $0x19] sm:$0xff]  ;;  %v2787_v7 = vld [vmem:[#allocation4 + $0x22] sm:$0xff] }
 0x9cb   : > { %v2567_v40 = vld [vmem:[#allocation4 + $0x18] sm:$0xff]  ;;  %3836 = vmatprep.subr.bf16.mxu0 %v3835_v37  ;;  %v2568_v42 = vld [vmem:[#allocation4 + $0x20] sm:$0xff]  ;;  %3656 = vmatprep.mubr.msk.f32.mxu1 %vm2560_vm12, %v2579_v0 }
 0x9cc   : > { %3678 = vmatprep.mubr.msk.f32.mxu0 %vm2560_vm12, %v2567_v40  ;;  %3657 = vmatmul.mubr.msk.f32.gmra.mrb[20].mxu1 %vm2560_vm12, %v2580_v45  ;;  %v2786_v58 = vld [vmem:[#allocation4 + $0x1a] sm:$0xff] }
 0x9cd   : > { %3679 = vmatmul.mubr.msk.f32.gmra.mrb[20].mxu0 %vm2560_vm12, %v2568_v42 }
 0x9ce   : > { %3838 = vmatpush3.bf16.msra.mxu0 %v3835_v37  ;;  %3697 = vmatprep.mubr.msk.f32.mxu0 %vm2560_vm12, %v2784_v52 }
 0x9cf   : > { %3840 = vmatprep.subr.bf16.mxu0 %v3839_v43 }
 0x9d2   : > { %3842 = vmatpush3.bf16.msra.mxu0 %v3839_v43 }
 0x9d3   : > { %3844 = vmatprep.subr.bf16.mxu0 %v3843_v55 }
 0x9d6   : > { %3846 = vmatpush3.bf16.msra.mxu0 %v3843_v55 }
 0x9d9   : > { %3698 = vmatmul.mubr.msk.f32.vlgmr.msra.gmra.mrb[18].mxu0 %vm2560_vm12, %v2785_v56 }
 0x9da   : > { %3700 = vmatprep.mubr.msk.f32.mxu0 %vm2560_vm12, %v2786_v58 }
 0x9dd   : > { %3701 = vmatmul.mubr.msk.f32.gmra.mrb[20].mxu0 %vm2560_vm12, %v2787_v7  ;;  %v3348_v7 = vld [vmem:[%s820_s24] ss:$0 sm:$0xff] }
 0xa9b   : > { %v3655_v62 = vpop.f32.mrb[18].mxu1 }
 0xa9c   : > { %v2668_v63 = vpop.f32.mrb[19].mxu1 }
 0xa9f   : > { %v3658_v3 = vpop.f32.mrb[20].mxu1 }
 0xaa0   : > { %v2678_v4 = vpop.f32.mrb[21].mxu1 }
 0xaac   : > { %v3699_v26 = vpop.f32.mrb[18].mxu0 }
 0xaad   : > { %v3847_v5 = vadd.f32 %v3699_v26, %v3655_v62  ;;  %v2875_v6 = vpop.f32.mrb[19].mxu0 }
 0xaae   : > { %v3848_v39 = vadd.f32 %v2875_v6, %v2668_v63 }
 0xaaf   : > { %v2906_v36 = vadd.f32 %v3847_v5, %v3347_v61 }
 0xab0   : > { %v2905_v41 = vadd.f32 %v3848_v39, %v3347_v61  ;;  %v3702_v28 = vpop.f32.mrb[20].mxu0 }
 0xab1   : > { %v3849_v15 = vadd.f32 %v3702_v28, %v3658_v3  ;;  %v2885_v30 = vpop.f32.mrb[21].mxu0  ;;  %v2910_v35 = vadd.f32 %v2906_v36, %v4580_v12  ;;  %v3349_v3 = vld [vmem:[%s823_s3] ss:$0 sm:$0xff]  ;;  %s4814_s3 = sld [smem:[#allocation11_spill]] }
 0xab2   : > { %v3850_v44 = vadd.f32 %v2885_v30, %v2678_v4  ;;  %v2909_v38 = vadd.f32 %v2905_v41, %v4584_v13 }
 0xab3   : > { %v2918_v46 = vsel %vm880_vm1, %v2910_v35, 0.0  ;;  %v2908_v9 = vadd.f32 %v3849_v15, %v3347_v61 }
 0xab4   : > { %v2907_v10 = vadd.f32 %v3850_v44, %v3347_v61  ;;  %2919 = vadd.xlane.f32.xlu0 %v2918_v46  ;;  %v2915_v25 = vsel %vm880_vm1, %v2909_v38, 0.0 }
 0xab5   : > { %2916 = vadd.xlane.f32.xlu1 %v2915_v25  ;;  %v2912_v21 = vadd.f32 %v2908_v9, %v4603_v53 }
 0xab6   : > { %v2911_v48 = vadd.f32 %v2907_v10, %v4595_v59 }
 0xab7   : > { %v2924_v12 = vsel %vm880_vm1, %v2912_v21, 0.0  ;;  %p3350_p11 = scmp.ne.s32.totalorder %s4814_s3, 1 }
 0xab8   : > { %v2921_v11 = vsel %vm880_vm1, %v2911_v48, 0.0 }
 0xab9   : > { %2922 = vadd.xlane.f32.xlu1 %v2921_v11 }
 0xabd   : > { %2925 = vadd.xlane.f32.xlu1 %v2924_v12 }
 0xb41   : > { %v2920_v22 = vpop.xlane.xlu0 %2919 }
 0xb42   : > { %v2928_v13 = vmul.f32 0.03125, %v2920_v22  ;;  %v2917_v16 = vpop.xlane.xlu1 %2916 }
 0xb43   : > { %v2927_v17 = vmul.f32 0.03125, %v2917_v16 }
 0xb44   : > { %v2932_v18 = vsub.f32 %v2910_v35, %v2928_v13 }
 0xb45   : > { %v2931_v60 = vsub.f32 %v2909_v38, %v2927_v17 }
 0xb46   : > { %v2923_v19 = vpop.xlane.xlu1 %2922  ;;  %v2936_v51 = vmul.f32 %v2932_v18, %v2932_v18 }
 0xb47   : > { %v2929_v23 = vmul.f32 0.03125, %v2923_v19  ;;  %v2935_v59 = vmul.f32 %v2931_v60, %v2931_v60 }
 0xb48   : > { %v2942_v54 = vsel %vm880_vm1, %v2936_v51, 0.0 }
 0xb49   : > { %v2933_v24 = vsub.f32 %v2911_v48, %v2929_v23  ;;  %2943 = vadd.xlane.f32.xlu1 %v2942_v54  ;;  %v2939_v29 = vsel %vm880_vm1, %v2935_v59, 0.0 }
 0xb4a   : > { %v2926_v27 = vpop.xlane.xlu1 %2925 }
 0xb4b   : > { %v2930_v53 = vmul.f32 0.03125, %v2926_v27  ;;  %v2937_v32 = vmul.f32 %v2933_v24, %v2933_v24 }
 0xb4d   : > { %v2934_v34 = vsub.f32 %v2912_v21, %v2930_v53  ;;  %2940 = vadd.xlane.f32.xlu1 %v2939_v29  ;;  %v2945_v37 = vsel %vm880_vm1, %v2937_v32, 0.0 }
 0xb4f   : > { %v2938_v33 = vmul.f32 %v2934_v34, %v2934_v34 }
 0xb51   : > { %2946 = vadd.xlane.f32.xlu1 %v2945_v37  ;;  %v2948_v2 = vsel %vm880_vm1, %v2938_v33, 0.0 }
 0xb55   : > { %2949 = vadd.xlane.f32.xlu1 %v2948_v2 }
 0xbd6   : > { %v2944_v1 = vpop.xlane.xlu1 %2943 }
 0xbd7   : > { %v2952_v0 = vmul.f32 0.03125, %v2944_v1 }
 0xbd9   : > { %v2956_v40 = vadd.f32 1e-05, %v2952_v0 }
 0xbda   : > { %v2941_v42 = vpop.xlane.xlu1 %2940 }
 0xbdb   : > { %3976 = vrsqrt.f32 %v2956_v40  ;;  %v2951_v43 = vmul.f32 0.03125, %v2941_v42 }
 0xbdd   : > { %v2955_v45 = vadd.f32 1e-05, %v2951_v43 }
 0xbde   : > { %v2947_v49 = vpop.xlane.xlu1 %2946 }
 0xbdf   : > { %3978 = vrsqrt.f32 %v2955_v45  ;;  %v2953_v50 = vmul.f32 0.03125, %v2947_v49 }
 0xbe1   : > { %v2957_v52 = vadd.f32 1e-05, %v2953_v50 }
 0xbe2   : > { %v2950_v55 = vpop.xlane.xlu1 %2949 }
 0xbe3   : > { %3980 = vrsqrt.f32 %v2957_v52  ;;  %v2954_v56 = vmul.f32 0.03125, %v2950_v55 }
 0xbe5   : > { %v3977_v58 = vpop.eup %3976  ;;  %v2958_v62 = vadd.f32 1e-05, %v2954_v56 }
 0xbe6   : > { %v2964_v63 = vmul.f32 %v3977_v58, %v2932_v18 }
 0xbe7   : > { %3982 = vrsqrt.f32 %v2958_v62 }
 0xbe8   : > { %v2974_v4 = vmul.f32 %v3348_v7, %v2964_v63 }
 0xbe9   : > { %v3979_v26 = vpop.eup %3978 }
 0xbea   : > { %v2984_v61 = vadd.f32 %v3349_v3, %v2974_v4  ;;  %v2963_v5 = vmul.f32 %v3979_v26, %v2931_v60 }
 0xbec   : > { %v2988_v6 = vmul.f32 %v3929_v8, %v2984_v61  ;;  %v2973_v39 = vmul.f32 %v3348_v7, %v2963_v5 }
 0xbed   : > { %v3981_v36 = vpop.eup %3980 }
 0xbee   : > { %2992 = vst.msk [vmem:[#allocation2 + $0x8] sm:$0xff] %vm880_vm1, %v2988_v6  ;;  %v2983_v41 = vadd.f32 %v3349_v3, %v2973_v39  ;;  %v2965_v28 = vmul.f32 %v3981_v36, %v2933_v24  ;;  %3000 = vst.msk [vmem:[#allocation7 + $0x8] sm:$0xff] (!%p3350_p11), %vm880_vm1, %v2988_v6 }
 0xbf0   : > { %v2987_v15 = vmul.f32 %v3928_v20, %v2983_v41  ;;  %v2975_v30 = vmul.f32 %v3348_v7, %v2965_v28 }
 0xbf1   : > { %v3983_v35 = vpop.eup %3982 }
 0xbf2   : > { %2991 = vst.msk [vmem:[#allocation2] sm:$0xff] %vm880_vm1, %v2987_v15  ;;  %v2985_v44 = vadd.f32 %v3349_v3, %v2975_v30  ;;  %v2966_v38 = vmul.f32 %v3983_v35, %v2934_v34  ;;  %2999 = vst.msk [vmem:[#allocation7] sm:$0xff] (!%p3350_p11), %vm880_vm1, %v2987_v15 }
 0xbf4   : > { %v2989_v46 = vmul.f32 %v3934_v14, %v2985_v44  ;;  %v2976_v9 = vmul.f32 %v3348_v7, %v2966_v38  ;;  %2998 = sbr.rel (%p3350_p11) target bundleno = 3067 (0xbfb), region = 96 }
 0xbf6   : > { %2993 = vst.msk [vmem:[#allocation2 + $0x10] sm:$0xff] %vm880_vm1, %v2989_v46  ;;  %v2986_v8 = vadd.f32 %v3349_v3, %v2976_v9  ;;  %3001 = vst.msk [vmem:[#allocation7 + $0x10] sm:$0xff] (!%p3350_p11), %vm880_vm1, %v2989_v46 }
 0xbf8   : > { %v2990_v10 = vmul.f32 %v3935_v57, %v2986_v8 }
 0xbfa   : > { %2994 = vst.msk [vmem:[#allocation2 + $0x18] sm:$0xff] %vm880_vm1, %v2990_v10  ;;  %3002 = vst.msk [vmem:[#allocation7 + $0x18] sm:$0xff] (!%p3350_p11), %vm880_vm1, %v2990_v10 }
 0xbfb PF: > { %s4815_s22 = sld [smem:[#allocation13_spill]]  ;;  %s4058_s21 = smov [#allocation7]  }
 0xbfc   : > { %s3013_s20 = sshll.u32 %s4058_s21, 4  ;;  %s3014_s20 = int_to_ptr.vmem [resolvable:$true] %s3013_s20 }
 0xbfd   : > { %s3996_s23 = scalar_lea.vmem %s3014_s20, 512  ;;  %p4003_p2 = scmp.lt.s32.totalorder %s3014_s20, %s3014_s20 }
 0xbfe   : > { %p3997_p13 = scmp.ne.s32.totalorder %s3014_s20, %s3996_s23  ;;  %p4004_p3 = scmp.lt.s32.totalorder %s3996_s23, %s3996_s23 }
 0xc00   : > { %p4005_p4 = por %p4004_p3, %p4003_p2 }
 0xc01   : > { %s4816_s24 = sadd.s32 4294967295, %s4815_s22  }
 0xc02   : > { %p4717_p12 = scmp.eq.s32.totalorder %s4816_s24, 1 }
 0xc04   : > { %p3998_p0 = pnand %p3997_p13, %p4717_p12 }
 0xc06   : > { %p3999_p1 = pneg %p3998_p0 }
 0xc08   : > { %p4006_p5 = pnand %p4005_p4, %p3999_p1 }
 0xc0a   : > { %4009 = shalt.err (!%p4006_p5)
}
 0xc0b   : > { %s4818_s5 = sld [smem:[#allocation25_spill]] }
 0xc11   : > { %s4010_s8 = scalar_lea.hbm %s4818_s5, 512 }
 0xc12   : > { %p4011_p6 = scmp.ne.s32.totalorder %s4818_s5, %s4010_s8  ;;  %p4016_p9 = scmp.lt.u32.totalorder %s4010_s8, %s4818_s5 }
 0xc14   : > { %p4012_p7 = pnand %p4011_p6, %p4717_p12 }
 0xc16   : > { %p4013_p8 = pneg %p4012_p7 }
 0xc18   : > { %p4018_p10 = pnand %p4016_p9, %p4013_p8 }
 0xc1a   : > { %4021 = shalt.err (!%p4018_p10)
}
 0xc1b   : > { %s4059_s19 = smov 128   ;;  %s4060_s0 = smov 8  }
 0xc1c   : > { %3866 = dma.vmem_to_hbm [thread:$0]  (%p4717_p12), %s3014_s20, 512, %s4818_s5, [#allocation8], %s4059_s19, %s4059_s19, %s4060_s0  }
 0xc1d   : > { %4037 = dma.done.wait (%p4717_p12), [#allocation8], 512  }
 0xc1e   : > { %4039 = vsyncadd (%p4717_p12), [#allocation8], 4294966784 }
 0xc1f PF: > { %s4819_s27 = sld [smem:[#allocation13_spill]]  ;;  %s4820_s19 = sld [smem:[#allocation12_spill]] }
 0xc20   : > { %s4821_s1 = sld [smem:[#allocation14_spill]] }
 0xc25   : > { %s35_s20 = sadd.s32 1, %s4819_s27  }
 0xc26   : > { %p32_p11 = scmp.ge.s32.totalorder %s35_s20, 4  }
 0xc28   :  { %34 = sbr.rel (!%p32_p11) target bundleno = 26 (0x1a), region = 176 }
 0xc2f   :  { %3029 = vsyncpa [#allocation8], 1 }
 0xc30   :  { %3031 = vsyncpa [#allocation8 + $0x1], 1 }

</bundles_post_ra>
